<compile_context>
chip_gen: v7x
topology: tpu7x:2x2x1
jax: 0.10.0
libtpu: 0.0.40
codegen_flags: <defaults>
</compile_context>

<pallas_src>
import functools
import math

import jax
import jax.numpy as jnp
from jax import lax
from jax.experimental import pallas as pl
from jax.experimental.pallas import tpu as pltpu


def _mhsa_kernel(q_ref, k_ref, v_ref,
                 wqt_ref, bq_ref, wkt_ref, bk_ref, wvt_ref, bv_ref,
                 wot_ref, bo_ref,
                 o_ref,
                 qp_scratch, ctx_acc,
                 *, num_heads, seq_len, key_tile):
    """Grid = (batch, key_tile). Block shapes:
         q:   (1, S, D)           k/v: (1, TK, D)
         wqT/wkT/wvT: (D, D)      woT: (H, hd, D)   biases: (1, D)
         out: (1, S, D)
       Scratch: qp_scratch (H, S, hd) in MXU dtype, ctx_acc (H, S, hd) f32."""
    kt = pl.program_id(1)
    H, S, TK = num_heads, seq_len, key_tile
    D = q_ref.shape[-1]
    hd = D // H
    scale = 1.0 / math.sqrt(hd)

    # ---- once per batch element: project q (all queries), fold in the scale,
    #      init the context accumulator ----
    @pl.when(kt == 0)
    def _():
        q = q_ref[0]                                                     # (S, D)
        qp = jnp.dot(q, wqt_ref[...],
                     preferred_element_type=jnp.float32) + bq_ref[0]     # (S, D)
        qp = (qp * scale).reshape(S, H, hd).astype(qp_scratch.dtype)
        qp_scratch[...] = jnp.transpose(qp, (1, 0, 2))                   # (H, S, hd)
        ctx_acc[...] = jnp.zeros_like(ctx_acc)

    # ---- per key tile: project k/v for this tile ----
    k_blk = k_ref[0]                                                     # (TK, D)
    v_blk = v_ref[0]
    kp = jnp.dot(k_blk, wkt_ref[...],
                 preferred_element_type=jnp.float32) + bk_ref[0]
    vp = jnp.dot(v_blk, wvt_ref[...],
                 preferred_element_type=jnp.float32) + bv_ref[0]
    kp = jnp.transpose(kp.reshape(TK, H, hd).astype(k_blk.dtype), (1, 0, 2))  # (H, TK, hd)
    vp = jnp.transpose(vp.reshape(TK, H, hd).astype(v_blk.dtype), (1, 0, 2))  # (H, TK, hd)

    qp_h = qp_scratch[...]                                               # (H, S, hd)

    # ---- head-batched scores + mask (scale already folded into qp) ----
    scores = jnp.einsum("hqd,hkd->hqk", qp_h, kp,
                        preferred_element_type=jnp.float32)              # (H, S, TK)
    row = lax.broadcasted_iota(jnp.int32, (1, S, TK), 1)                 # query index
    col = lax.broadcasted_iota(jnp.int32, (1, S, TK), 2) + kt * TK       # global key index
    scores = jnp.where(col >= row, jnp.float32(-1e9), scores)            # triu incl. diag

    # ---- softmax over the QUERY axis (dim=-2); complete within each key tile ----
    m = jnp.max(scores, axis=1, keepdims=True)                           # (H, 1, TK)
    e = jnp.exp(scores - m)
    p = e * pl.reciprocal(jnp.sum(e, axis=1, keepdims=True), approx=True)

    # ---- accumulate p @ v over key tiles ----
    ctx_acc[...] += jnp.einsum("hqk,hkd->hqd", p.astype(vp.dtype), vp,
                               preferred_element_type=jnp.float32)       # (H, S, hd)

    # ---- last key tile: output projection (no concat; per-head matmul + sum) ----
    @pl.when(kt == pl.num_programs(1) - 1)
    def _():
        ctx = ctx_acc[...].astype(wot_ref.dtype)                         # (H, S, hd)
        out = jnp.einsum("hqd,hde->hqe", ctx, wot_ref[...],
                         preferred_element_type=jnp.float32)             # (H, S, D)
        out = jnp.sum(out, axis=0) + bo_ref[0]                           # (S, D)
        o_ref[0] = out.astype(o_ref.dtype)


def multi_head_self_attention(q, k, v, params, *, num_heads,
                              key_tile=None, mxu_dtype=None):
    B, S, D = q.shape
    assert D % num_heads == 0
    hd = D // num_heads
    wq, bq, wk, bk, wv, bv, wo, bo = params

    if key_tile is None:
        key_tile = S if S <= 512 else 512
    assert S % key_tile == 0, "seq_len must be divisible by key_tile"
    nkt = S // key_tile

    out_dtype = q.dtype
    if mxu_dtype is None:
        mxu_dtype = q.dtype

    # Pre-transpose weights ONCE outside the kernel (feeds the MXU directly).
    wqt = wq.T.astype(mxu_dtype)                              # (D_in, D_out)
    wkt = wk.T.astype(mxu_dtype)
    wvt = wv.T.astype(mxu_dtype)
    wot = wo.T.reshape(num_heads, hd, D).astype(mxu_dtype)    # (H, hd, D_out)
    bq2, bk2, bv2, bo2 = (b.reshape(1, D).astype(jnp.float32)
                          for b in (bq, bk, bv, bo))

    qc = q.astype(mxu_dtype)
    kc = k.astype(mxu_dtype)
    vc = v.astype(mxu_dtype)

    q_spec = pl.BlockSpec((1, S, D), lambda b, kt: (b, 0, 0))
    kv_spec = pl.BlockSpec((1, key_tile, D), lambda b, kt: (b, kt, 0))
    w_spec = pl.BlockSpec((D, D), lambda b, kt: (0, 0))
    wo_spec = pl.BlockSpec((num_heads, hd, D), lambda b, kt: (0, 0, 0))
    b_spec = pl.BlockSpec((1, D), lambda b, kt: (0, 0))
    out_spec = pl.BlockSpec((1, S, D), lambda b, kt: (b, 0, 0))

    kernel = functools.partial(_mhsa_kernel, num_heads=num_heads,
                               seq_len=S, key_tile=key_tile)

    return pl.pallas_call(
        kernel,
        out_shape=jax.ShapeDtypeStruct((B, S, D), out_dtype),
        grid_spec=pltpu.PrefetchScalarGridSpec(
            num_scalar_prefetch=0,
            grid=(B, nkt),
            in_specs=[q_spec, kv_spec, kv_spec,
                      w_spec, b_spec, w_spec, b_spec, w_spec, b_spec,
                      wo_spec, b_spec],
            out_specs=out_spec,
            scratch_shapes=[pltpu.VMEM((num_heads, S, hd), mxu_dtype),    # cached q-proj
                            pltpu.VMEM((num_heads, S, hd), jnp.float32)]  # ctx accumulator
        ),
        compiler_params=pltpu.CompilerParams(
            dimension_semantics=("parallel", "arbitrary"),
            vmem_limit_bytes=32 * 1024 * 1024),
    )(qc, kc, vc, wqt, bq2, wkt, bk2, wvt, bv2, wot, bo2)


def _reference(q, k, v, params, *, num_heads):
    """Pure-JAX re-implementation of the PyTorch forward for validation."""
    wq, bq, wk, bk, wv, bv, wo, bo = params
    B, S, D = q.shape
    hd = D // num_heads

    def proj(x, w, b):
        y = x @ w.T + b
        return y.reshape(B, S, num_heads, hd).transpose(0, 2, 1, 3)   # (B,H,S,hd)

    qh, kh, vh = proj(q, wq, bq), proj(k, wk, bk), proj(v, wv, bv)
    scores = jnp.einsum("bhqd,bhkd->bhqk", qh, kh) / math.sqrt(hd)
    mask = jnp.triu(jnp.ones((S, S), dtype=bool))
    scores = jnp.where(mask, -1e9, scores)
    p = jax.nn.softmax(scores, axis=-2)             # softmax over the query axis (!)
    ctx = jnp.einsum("bhqk,bhkd->bhqd", p, vh)
    ctx = ctx.transpose(0, 2, 1, 3).reshape(B, S, D)
    return ctx @ wo.T + bo


def _init_params(key, dim_model):
    # torch.nn.Linear default: U(-1/sqrt(in), 1/sqrt(in)) for both W and b.
    bound = 1.0 / math.sqrt(dim_model)
    keys = jax.random.split(key, 8)
    params = []
    for i in range(4):
        w = jax.random.uniform(keys[2 * i], (dim_model, dim_model),
                               minval=-bound, maxval=bound, dtype=jnp.float32)
        b = jax.random.uniform(keys[2 * i + 1], (dim_model,),
                               minval=-bound, maxval=bound, dtype=jnp.float32)
        params += [w, b]
    return tuple(params)


if __name__ == "__main__":
    # NOTE: demo shapes are intentionally tiny; for real benchmarking use
    # D a multiple of 128 and head_dim >= 128 so the MXU is actually exercised.
    B, S, D, H = 2, 8, 32, 4  # batch, seq_len, dim_model, num_heads

    key = jax.random.PRNGKey(0)
    kq, kk, kv, kp = jax.random.split(key, 4)
    q = jax.random.normal(kq, (B, S, D), dtype=jnp.float32)
    k = jax.random.normal(kk, (B, S, D), dtype=jnp.float32)
    v = jax.random.normal(kv, (B, S, D), dtype=jnp.float32)
    params = _init_params(kp, D)

    ref = _reference(q, k, v, params, num_heads=H)

    # f32 MXU operands (v5e-friendly; exp/softmax always f32).
    out = multi_head_self_attention(q, k, v, params, num_heads=H)
    out = jax.block_until_ready(out)
    assert out.shape == (B, S, D) and out.dtype == jnp.float32
    # approx reciprocal in the softmax denominator -> tolerance relaxed vs 1e-4.
    assert jnp.allclose(out, ref, atol=1e-2, rtol=1e-2), "f32 kernel mismatch vs reference"

    # bf16 MXU operands (v6e/v7x path); mask/softmax/accumulation remain f32.
    out_bf16 = multi_head_self_attention(q, k, v, params, num_heads=H,
                                         mxu_dtype=jnp.bfloat16)
    out_bf16 = jax.block_until_ready(out_bf16)
    assert out_bf16.shape == (B, S, D) and out_bf16.dtype == jnp.float32
    assert jnp.allclose(out_bf16, ref, atol=7e-2, rtol=7e-2), "bf16 kernel mismatch vs reference"

    print("KERNEL_OK")
</pallas_src>

<mosaic_0001>
module attributes {stable_mosaic.version = 11 : i64} {
  func.func @_mhsa_kernel(%arg0: i32, %arg1: i32, %arg2: memref<1x8x32xf32, #tpu.memory_space<vmem>>, %arg3: memref<1x8x32xf32, #tpu.memory_space<vmem>>, %arg4: memref<1x8x32xf32, #tpu.memory_space<vmem>>, %arg5: memref<32x32xf32, #tpu.memory_space<vmem>>, %arg6: memref<1x32xf32, #tpu.memory_space<vmem>>, %arg7: memref<32x32xf32, #tpu.memory_space<vmem>>, %arg8: memref<1x32xf32, #tpu.memory_space<vmem>>, %arg9: memref<32x32xf32, #tpu.memory_space<vmem>>, %arg10: memref<1x32xf32, #tpu.memory_space<vmem>>, %arg11: memref<4x8x32xf32, #tpu.memory_space<vmem>>, %arg12: memref<1x32xf32, #tpu.memory_space<vmem>>, %arg13: memref<1x8x32xf32, #tpu.memory_space<vmem>>, %arg14: memref<4x8x8xf32, #tpu.memory_space<vmem>>, %arg15: memref<4x8x8xf32, #tpu.memory_space<vmem>>) attributes {dimension_semantics = [#tpu.dimension_semantics<parallel>, #tpu.dimension_semantics<arbitrary>], iteration_bounds = array<i64: 2, 1>, scalar_prefetch = 0 : i64, scratch_operands = 2 : i64, tpu.core_type = #tpu.core_type<tc>, window_params = [{transform_indices = @transform_0, window_bounds = array<i64: 1, 8, 32>}, {transform_indices = @transform_1, window_bounds = array<i64: 1, 8, 32>}, {transform_indices = @transform_2, window_bounds = array<i64: 1, 8, 32>}, {pipeline_mode = #tpu.pipeline_mode<synchronous>, transform_indices = @transform_3, window_bounds = array<i64: 32, 32>}, {pipeline_mode = #tpu.pipeline_mode<synchronous>, transform_indices = @transform_4, window_bounds = array<i64: 1, 32>}, {pipeline_mode = #tpu.pipeline_mode<synchronous>, transform_indices = @transform_5, window_bounds = array<i64: 32, 32>}, {pipeline_mode = #tpu.pipeline_mode<synchronous>, transform_indices = @transform_6, window_bounds = array<i64: 1, 32>}, {pipeline_mode = #tpu.pipeline_mode<synchronous>, transform_indices = @transform_7, window_bounds = array<i64: 32, 32>}, {pipeline_mode = #tpu.pipeline_mode<synchronous>, transform_indices = @transform_8, window_bounds = array<i64: 1, 32>}, {pipeline_mode = #tpu.pipeline_mode<synchronous>, transform_indices = @transform_9, window_bounds = array<i64: 4, 8, 32>}, {pipeline_mode = #tpu.pipeline_mode<synchronous>, transform_indices = @transform_10, window_bounds = array<i64: 1, 32>}, {transform_indices = @transform_11, window_bounds = array<i64: 1, 8, 32>}]} {
    %c0_i32 = arith.constant 0 : i32
    %0 = arith.cmpi eq, %arg1, %c0_i32 : i32
    %1 = arith.extui %0 : i1 to i32
    %c0_i32_0 = arith.constant 0 : i32
    %2 = arith.cmpi ne, %1, %c0_i32_0 : i32
    scf.if %2 {
      %c0_31 = arith.constant 0 : index
      %c0_32 = arith.constant 0 : index
      %c0_33 = arith.constant 0 : index
      %54 = vector.load %arg2[%c0_31, %c0_32, %c0_33] : memref<1x8x32xf32, #tpu.memory_space<vmem>>, vector<1x8x32xf32>
      %55 = vector.shape_cast %54 : vector<1x8x32xf32> to vector<8x32xf32>
      %c0_34 = arith.constant 0 : index
      %c0_35 = arith.constant 0 : index
      %56 = vector.load %arg5[%c0_34, %c0_35] : memref<32x32xf32, #tpu.memory_space<vmem>>, vector<32x32xf32>
      %cst_36 = arith.constant dense<0.000000e+00> : vector<8x32xf32>
      %57 = tpu.matmul %55, %56, %cst_36 {dimension_numbers = #tpu.dot_dimension_numbers<[1], [0], [0], [1], [0, 0, 1, 1], [], []>} : vector<8x32xf32>, vector<32x32xf32>, vector<8x32xf32> -> vector<8x32xf32>
      %c0_37 = arith.constant 0 : index
      %c0_38 = arith.constant 0 : index
      %58 = vector.load %arg6[%c0_37, %c0_38] : memref<1x32xf32, #tpu.memory_space<vmem>>, vector<1x32xf32>
      %59 = vector.shape_cast %58 : vector<1x32xf32> to vector<32xf32>
      %60 = vector.shape_cast %59 : vector<32xf32> to vector<1x32xf32>
      %61 = vector.broadcast %60 : vector<1x32xf32> to vector<8x32xf32>
      %62 = arith.addf %57, %61 : vector<8x32xf32>
      %cst_39 = arith.constant 0.353553385 : f32
      %63 = vector.broadcast %cst_39 : f32 to vector<8x32xf32>
      %64 = arith.mulf %62, %63 : vector<8x32xf32>
      %65 = vector.shape_cast %64 : vector<8x32xf32> to vector<8x4x8xf32>
      %66 = tpu.transpose %65, [1, 0, 2] : vector<8x4x8xf32> -> vector<4x8x8xf32>
      %c0_40 = arith.constant 0 : index
      %c0_41 = arith.constant 0 : index
      %c0_42 = arith.constant 0 : index
      %67 = vector.load %arg14[%c0_40, %c0_41, %c0_42] : memref<4x8x8xf32, #tpu.memory_space<vmem>>, vector<4x8x8xf32>
      tpu.vector_store %arg14[%c0_40, %c0_41, %c0_42], %66 {strides = array<i32>} : memref<4x8x8xf32, #tpu.memory_space<vmem>>, vector<4x8x8xf32>,
      %cst_43 = arith.constant 0.000000e+00 : f32
      %68 = vector.broadcast %cst_43 : f32 to vector<4x8x8xf32>
      %c0_44 = arith.constant 0 : index
      %c0_45 = arith.constant 0 : index
      %c0_46 = arith.constant 0 : index
      %69 = vector.load %arg15[%c0_44, %c0_45, %c0_46] : memref<4x8x8xf32, #tpu.memory_space<vmem>>, vector<4x8x8xf32>
      tpu.vector_store %arg15[%c0_44, %c0_45, %c0_46], %68 {strides = array<i32>} : memref<4x8x8xf32, #tpu.memory_space<vmem>>, vector<4x8x8xf32>,
    } else {
    }
    %c0 = arith.constant 0 : index
    %c0_1 = arith.constant 0 : index
    %c0_2 = arith.constant 0 : index
    %3 = vector.load %arg3[%c0, %c0_1, %c0_2] : memref<1x8x32xf32, #tpu.memory_space<vmem>>, vector<1x8x32xf32>
    %4 = vector.shape_cast %3 : vector<1x8x32xf32> to vector<8x32xf32>
    %c0_3 = arith.constant 0 : index
    %c0_4 = arith.constant 0 : index
    %c0_5 = arith.constant 0 : index
    %5 = vector.load %arg4[%c0_3, %c0_4, %c0_5] : memref<1x8x32xf32, #tpu.memory_space<vmem>>, vector<1x8x32xf32>
    %6 = vector.shape_cast %5 : vector<1x8x32xf32> to vector<8x32xf32>
    %c0_6 = arith.constant 0 : index
    %c0_7 = arith.constant 0 : index
    %7 = vector.load %arg7[%c0_6, %c0_7] : memref<32x32xf32, #tpu.memory_space<vmem>>, vector<32x32xf32>
    %cst = arith.constant dense<0.000000e+00> : vector<8x32xf32>
    %8 = tpu.matmul %4, %7, %cst {dimension_numbers = #tpu.dot_dimension_numbers<[1], [0], [0], [1], [0, 0, 1, 1], [], []>} : vector<8x32xf32>, vector<32x32xf32>, vector<8x32xf32> -> vector<8x32xf32>
    %c0_8 = arith.constant 0 : index
    %c0_9 = arith.constant 0 : index
    %9 = vector.load %arg8[%c0_8, %c0_9] : memref<1x32xf32, #tpu.memory_space<vmem>>, vector<1x32xf32>
    %10 = vector.shape_cast %9 : vector<1x32xf32> to vector<32xf32>
    %11 = vector.shape_cast %10 : vector<32xf32> to vector<1x32xf32>
    %12 = vector.broadcast %11 : vector<1x32xf32> to vector<8x32xf32>
    %13 = arith.addf %8, %12 : vector<8x32xf32>
    %c0_10 = arith.constant 0 : index
    %c0_11 = arith.constant 0 : index
    %14 = vector.load %arg9[%c0_10, %c0_11] : memref<32x32xf32, #tpu.memory_space<vmem>>, vector<32x32xf32>
    %cst_12 = arith.constant dense<0.000000e+00> : vector<8x32xf32>
    %15 = tpu.matmul %6, %14, %cst_12 {dimension_numbers = #tpu.dot_dimension_numbers<[1], [0], [0], [1], [0, 0, 1, 1], [], []>} : vector<8x32xf32>, vector<32x32xf32>, vector<8x32xf32> -> vector<8x32xf32>
    %c0_13 = arith.constant 0 : index
    %c0_14 = arith.constant 0 : index
    %16 = vector.load %arg10[%c0_13, %c0_14] : memref<1x32xf32, #tpu.memory_space<vmem>>, vector<1x32xf32>
    %17 = vector.shape_cast %16 : vector<1x32xf32> to vector<32xf32>
    %18 = vector.shape_cast %17 : vector<32xf32> to vector<1x32xf32>
    %19 = vector.broadcast %18 : vector<1x32xf32> to vector<8x32xf32>
    %20 = arith.addf %15, %19 : vector<8x32xf32>
    %21 = vector.shape_cast %13 : vector<8x32xf32> to vector<8x4x8xf32>
    %22 = tpu.transpose %21, [1, 0, 2] : vector<8x4x8xf32> -> vector<4x8x8xf32>
    %23 = vector.shape_cast %20 : vector<8x32xf32> to vector<8x4x8xf32>
    %24 = tpu.transpose %23, [1, 0, 2] : vector<8x4x8xf32> -> vector<4x8x8xf32>
    %c0_15 = arith.constant 0 : index
    %c0_16 = arith.constant 0 : index
    %c0_17 = arith.constant 0 : index
    %25 = vector.load %arg14[%c0_15, %c0_16, %c0_17] : memref<4x8x8xf32, #tpu.memory_space<vmem>>, vector<4x8x8xf32>
    "tpu.trace_start"() <{level = 10 : i32, message = "hqd,hkd->hqk"}> : () -> ()
    %cst_18 = arith.constant dense<0.000000e+00> : vector<4x8x8xf32>
    %26 = tpu.matmul %25, %22, %cst_18 {dimension_numbers = #tpu.dot_dimension_numbers<[2], [2], [1], [1], [0, 0, 0, 1, 1, 1], [0], [0]>} : vector<4x8x8xf32>, vector<4x8x8xf32>, vector<4x8x8xf32> -> vector<4x8x8xf32>
    "tpu.trace_stop"() : () -> ()
    %27 = tpu.iota {dimensions = array<i32: 1>} : vector<1x8x8xi32>
    %28 = tpu.iota {dimensions = array<i32: 2>} : vector<1x8x8xi32>
    %c8_i32 = arith.constant 8 : i32
    %29 = arith.muli %arg1, %c8_i32 : i32
    %30 = vector.broadcast %29 : i32 to vector<1x8x8xi32>
    %31 = arith.addi %28, %30 : vector<1x8x8xi32>
    %32 = arith.cmpi sge, %31, %27 : vector<1x8x8xi32>
    %cst_19 = arith.constant -1.000000e+09 : f32
    %33 = vector.shape_cast %32 : vector<1x8x8xi1> to vector<1x8x8xi1>
    %34 = vector.broadcast %33 : vector<1x8x8xi1> to vector<4x8x8xi1>
    %35 = vector.broadcast %cst_19 : f32 to vector<4x8x8xf32>
    %36 = arith.select %34, %35, %26 : vector<4x8x8xi1>, vector<4x8x8xf32>
    %cst_20 = arith.constant dense<0xFF800000> : vector<4x8xf32>
    %37 = vector.multi_reduction <maximumf>, %36, %cst_20 [1] : vector<4x8x8xf32> to vector<4x8xf32>
    %38 = vector.shape_cast %37 : vector<4x8xf32> to vector<4x1x8xf32>
    %39 = vector.broadcast %38 : vector<4x1x8xf32> to vector<4x8x8xf32>
    %40 = arith.subf %36, %39 : vector<4x8x8xf32>
    %41 = math.exp %40 : vector<4x8x8xf32>
    %cst_21 = arith.constant dense<0.000000e+00> : vector<4x8xf32>
    %42 = vector.multi_reduction <add>, %41, %cst_21 [1] : vector<4x8x8xf32> to vector<4x8xf32>
    %43 = vector.shape_cast %42 : vector<4x8xf32> to vector<4x1x8xf32>
    %44 = tpu.reciprocal %43 {approx = true} : vector<4x1x8xf32> -> vector<4x1x8xf32>
    %45 = vector.broadcast %44 : vector<4x1x8xf32> to vector<4x8x8xf32>
    %46 = arith.mulf %41, %45 : vector<4x8x8xf32>
    %c0_22 = arith.constant 0 : index
    %c0_23 = arith.constant 0 : index
    %c0_24 = arith.constant 0 : index
    %47 = vector.load %arg15[%c0_22, %c0_23, %c0_24] : memref<4x8x8xf32, #tpu.memory_space<vmem>>, vector<4x8x8xf32>
    "tpu.trace_start"() <{level = 10 : i32, message = "hqk,hkd->hqd"}> : () -> ()
    %cst_25 = arith.constant dense<0.000000e+00> : vector<4x8x8xf32>
    %48 = tpu.matmul %46, %24, %cst_25 {dimension_numbers = #tpu.dot_dimension_numbers<[2], [1], [1], [2], [0, 0, 0, 1, 1, 2], [0], [0]>} : vector<4x8x8xf32>, vector<4x8x8xf32>, vector<4x8x8xf32> -> vector<4x8x8xf32>
    "tpu.trace_stop"() : () -> ()
    %49 = arith.addf %47, %48 : vector<4x8x8xf32>
    %c0_26 = arith.constant 0 : index
    %c0_27 = arith.constant 0 : index
    %c0_28 = arith.constant 0 : index
    %50 = vector.load %arg15[%c0_26, %c0_27, %c0_28] : memref<4x8x8xf32, #tpu.memory_space<vmem>>, vector<4x8x8xf32>
    tpu.vector_store %arg15[%c0_26, %c0_27, %c0_28], %49 {strides = array<i32>} : memref<4x8x8xf32, #tpu.memory_space<vmem>>, vector<4x8x8xf32>,
    %c0_i32_29 = arith.constant 0 : i32
    %51 = arith.cmpi eq, %arg1, %c0_i32_29 : i32
    %52 = arith.extui %51 : i1 to i32
    %c0_i32_30 = arith.constant 0 : i32
    %53 = arith.cmpi ne, %52, %c0_i32_30 : i32
    scf.if %53 {
      %c0_31 = arith.constant 0 : index
      %c0_32 = arith.constant 0 : index
      %c0_33 = arith.constant 0 : index
      %54 = vector.load %arg15[%c0_31, %c0_32, %c0_33] : memref<4x8x8xf32, #tpu.memory_space<vmem>>, vector<4x8x8xf32>
      %c0_34 = arith.constant 0 : index
      %c0_35 = arith.constant 0 : index
      %c0_36 = arith.constant 0 : index
      %55 = vector.load %arg11[%c0_34, %c0_35, %c0_36] : memref<4x8x32xf32, #tpu.memory_space<vmem>>, vector<4x8x32xf32>
      "tpu.trace_start"() <{level = 10 : i32, message = "hqd,hde->hqe"}> : () -> ()
      %cst_37 = arith.constant dense<0.000000e+00> : vector<4x8x32xf32>
      %56 = tpu.matmul %54, %55, %cst_37 {dimension_numbers = #tpu.dot_dimension_numbers<[2], [1], [1], [2], [0, 0, 0, 1, 1, 2], [0], [0]>} : vector<4x8x8xf32>, vector<4x8x32xf32>, vector<4x8x32xf32> -> vector<4x8x32xf32>
      "tpu.trace_stop"() : () -> ()
      %cst_38 = arith.constant dense<0.000000e+00> : vector<8x32xf32>
      %57 = vector.multi_reduction <add>, %56, %cst_38 [0] : vector<4x8x32xf32> to vector<8x32xf32>
      %c0_39 = arith.constant 0 : index
      %c0_40 = arith.constant 0 : index
      %58 = vector.load %arg12[%c0_39, %c0_40] : memref<1x32xf32, #tpu.memory_space<vmem>>, vector<1x32xf32>
      %59 = vector.shape_cast %58 : vector<1x32xf32> to vector<32xf32>
      %60 = vector.shape_cast %59 : vector<32xf32> to vector<1x32xf32>
      %61 = vector.broadcast %60 : vector<1x32xf32> to vector<8x32xf32>
      %62 = arith.addf %57, %61 : vector<8x32xf32>
      %c0_41 = arith.constant 0 : index
      %c0_42 = arith.constant 0 : index
      %c0_43 = arith.constant 0 : index
      %63 = vector.load %arg13[%c0_41, %c0_42, %c0_43] : memref<1x8x32xf32, #tpu.memory_space<vmem>>, vector<1x8x32xf32>
      %64 = vector.shape_cast %63 : vector<1x8x32xf32> to vector<8x32xf32>
      %65 = vector.shape_cast %62 : vector<8x32xf32> to vector<1x8x32xf32>
      tpu.vector_store %arg13[%c0_41, %c0_42, %c0_43], %65 {strides = array<i32>} : memref<1x8x32xf32, #tpu.memory_space<vmem>>, vector<1x8x32xf32>,
    } else {
    }
    return
  }
  func.func @transform_0(%arg0: i32, %arg1: i32) -> (i32, i32, i32) {
    %c0_i32 = arith.constant 0 : i32
    %c0_i32_0 = arith.constant 0 : i32
    %c0_i32_1 = arith.constant 0 : i32
    return %arg0, %c0_i32, %c0_i32_0 : i32, i32, i32
  }
  func.func @transform_1(%arg0: i32, %arg1: i32) -> (i32, i32, i32) {
    %c0_i32 = arith.constant 0 : i32
    %c0_i32_0 = arith.constant 0 : i32
    return %arg0, %arg1, %c0_i32 : i32, i32, i32
  }
  func.func @transform_2(%arg0: i32, %arg1: i32) -> (i32, i32, i32) {
    %c0_i32 = arith.constant 0 : i32
    %c0_i32_0 = arith.constant 0 : i32
    return %arg0, %arg1, %c0_i32 : i32, i32, i32
  }
  func.func @transform_3(%arg0: i32, %arg1: i32) -> (i32, i32) {
    %c0_i32 = arith.constant 0 : i32
    %c0_i32_0 = arith.constant 0 : i32
    %c0_i32_1 = arith.constant 0 : i32
    return %c0_i32, %c0_i32_0 : i32, i32
  }
  func.func @transform_4(%arg0: i32, %arg1: i32) -> (i32, i32) {
    %c0_i32 = arith.constant 0 : i32
    %c0_i32_0 = arith.constant 0 : i32
    %c0_i32_1 = arith.constant 0 : i32
    return %c0_i32, %c0_i32_0 : i32, i32
  }
  func.func @transform_5(%arg0: i32, %arg1: i32) -> (i32, i32) {
    %c0_i32 = arith.constant 0 : i32
    %c0_i32_0 = arith.constant 0 : i32
    %c0_i32_1 = arith.constant 0 : i32
    return %c0_i32, %c0_i32_0 : i32, i32
  }
  func.func @transform_6(%arg0: i32, %arg1: i32) -> (i32, i32) {
    %c0_i32 = arith.constant 0 : i32
    %c0_i32_0 = arith.constant 0 : i32
    %c0_i32_1 = arith.constant 0 : i32
    return %c0_i32, %c0_i32_0 : i32, i32
  }
  func.func @transform_7(%arg0: i32, %arg1: i32) -> (i32, i32) {
    %c0_i32 = arith.constant 0 : i32
    %c0_i32_0 = arith.constant 0 : i32
    %c0_i32_1 = arith.constant 0 : i32
    return %c0_i32, %c0_i32_0 : i32, i32
  }
  func.func @transform_8(%arg0: i32, %arg1: i32) -> (i32, i32) {
    %c0_i32 = arith.constant 0 : i32
    %c0_i32_0 = arith.constant 0 : i32
    %c0_i32_1 = arith.constant 0 : i32
    return %c0_i32, %c0_i32_0 : i32, i32
  }
  func.func @transform_9(%arg0: i32, %arg1: i32) -> (i32, i32, i32) {
    %c0_i32 = arith.constant 0 : i32
    %c0_i32_0 = arith.constant 0 : i32
    %c0_i32_1 = arith.constant 0 : i32
    %c0_i32_2 = arith.constant 0 : i32
    return %c0_i32, %c0_i32_0, %c0_i32_1 : i32, i32, i32
  }
  func.func @transform_10(%arg0: i32, %arg1: i32) -> (i32, i32) {
    %c0_i32 = arith.constant 0 : i32
    %c0_i32_0 = arith.constant 0 : i32
    %c0_i32_1 = arith.constant 0 : i32
    return %c0_i32, %c0_i32_0 : i32, i32
  }
  func.func @transform_11(%arg0: i32, %arg1: i32) -> (i32, i32, i32) {
    %c0_i32 = arith.constant 0 : i32
    %c0_i32_0 = arith.constant 0 : i32
    %c0_i32_1 = arith.constant 0 : i32
    return %arg0, %c0_i32, %c0_i32_0 : i32, i32, i32
  }
}

</mosaic_0001>

<bundles_post_ra>
// kernel: tpu_custom_call.1
= control target key start
LH: loop header
LB: loop body
LE: loop exit
PB: predicated region body
PF: predicated region fallthrough
CT: control target
= control target key end

     0   :  { %s3758_s0 = inlined_call_operand.hbm [shape: f32[2,8,32], index: 0, kind: input, shape index: {}]   ;;  %s3759_s1 = inlined_call_operand.hbm [shape: f32[2,8,32], index: 1, kind: input, shape index: {}]   ;;  %s3760_s2 = inlined_call_operand.hbm [shape: f32[2,8,32], index: 2, kind: input, shape index: {}]   ;;  %s3761_s3 = inlined_call_operand.hbm [shape: f32[32,32], index: 3, kind: input, shape index: {}]   ;;  %s3762_s4 = inlined_call_operand.vmem [shape: f32[1,32], index: 4, kind: input, shape index: {}]   ;;  %s3763_s5 = inlined_call_operand.hbm [shape: f32[32,32], index: 5, kind: input, shape index: {}]   ;;  %s3764_s6 = inlined_call_operand.vmem [shape: f32[1,32], index: 6, kind: input, shape index: {}]   ;;  %s3765_s7 = inlined_call_operand.hbm [shape: f32[32,32], index: 7, kind: input, shape index: {}]   ;;  %s3766_s8 = inlined_call_operand.hbm [shape: f32[1,32], index: 8, kind: input, shape index: {}]   ;;  %s3767_s9 = inlined_call_operand.vmem [shape: f32[4,8,32], index: 9, kind: input, shape index: {}]   ;;  %s3768_s10 = inlined_call_operand.vmem [shape: f32[1,32], index: 10, kind: input, shape index: {}]   ;;  %s3769_s11 = inlined_call_operand.hbm [shape: f32[2,8,32], index: 11, kind: output, shape index: {}]  }
   0x1   :  { %3795 = sst [smem:[#allocation30_spill]] %s3759_s1 }
   0x2   :  { %3796 = sst [smem:[#allocation31_spill]] %s3761_s3 }
   0x3   :  { %3797 = sst [smem:[#allocation32_spill]] %s3765_s7 }
   0x4   :  { %3798 = sst [smem:[#allocation33_spill]] %s3767_s9 }
   0x5   :  { %3799 = sst [smem:[#allocation34_spill]] %s3768_s10 }
   0x6   :  { %3800 = sst [smem:[#allocation35_spill]] %s3769_s11 }
   0x7   :  { %16 = vsyncpa [#allocation5], 0 }
   0x8   :  { %18 = vsyncpa [#allocation5 + $0x1], 0 }
   0x9   :  { %19 = vsyncpa [#allocation8], 0 }
   0xa   :  { %21 = vsyncpa [#allocation8 + $0x1], 0 }
   0xb   :  { %22 = vsyncpa [#allocation11], 0 }
   0xc   :  { %23 = vsyncpa [#allocation14], 0 }
   0xd   :  { %24 = vsyncpa [#allocation6], 0 }
   0xe   :  { %26 = vsyncpa [#allocation6 + $0x1], 0  ;;  %s3174_s17 = smov 0   ;;  %s3176_s18 = smov 0  }
   0xf   :  { %s3178_s19 = smov 0   ;;  %s3180_s20 = smov 0  }
  0x10   :  { %s3182_s21 = smov 0   ;;  %s3184_s22 = smov 0  }
  0x11 LB: > { %3801 = sst [smem:[#allocation22_spill]] %s3074_s17  ;;  %s3205_s23 = sadd.s32 4294967295, %s3094_s22   ;;  %s3094_s22 = sphi %s3184_s22, %s32_s22   ;;  %s3090_s21 = sphi %s3182_s21, %s3848_s21   ;;  %s3086_s20 = sphi %s3180_s20, %s3847_s20   ;;  %s3082_s19 = sphi %s3178_s19, %s3851_s19   ;;  %s3078_s18 = sphi %s3176_s18, %s3850_s18   ;;  %s3074_s17 = sphi %s3174_s17, %s3849_s17  }
  0x12   : > { %3802 = sst [smem:[#allocation23_spill]] %s3086_s20  ;;  %p2455_p0 = scmp.ge.s32.totalorder %s3094_s22, 1 }
  0x13   : > { %3803 = sst [smem:[#allocation24_spill]] %s3090_s21  ;;  %p3779_p1 = scmp.eq.s32.totalorder %s3205_s23, 0 }
  0x14   : > { %3804 = sst [smem:[#allocation25_spill]] %s3094_s22  ;;  %p325_p2 = scmp.lt.s32.totalorder %s3094_s22, 3 }
  0x15   : > { %s3096_s25 = smov [#allocation10]   ;;  %s3097_s28 = smov [#allocation13]  }
  0x16   : > { %p3210_p3 = pnand %p2455_p0, %p325_p2  ;;  %s337_s26 = sshll.u32 %s3096_s25, 4  ;;  %s3214_s26 = int_to_ptr.vmem [resolvable:$true] %s337_s26 }
  0x17   : > { %s369_s29 = sshll.u32 %s3097_s28, 4  ;;  %s3807_s3 = sld [smem:[#allocation31_spill]]  ;;  %s3225_s29 = int_to_ptr.vmem [resolvable:$true] %s369_s29 }
  0x18   : > { %s3805_s24 = scalar_select %p3210_p3, 1, 0 }
  0x19   : > { %p2683_p4 = pneg %p3210_p3 }
  0x1b   : > { %p3221_p6 = pnand %p2683_p4, %p3779_p1 }
  0x1d   : > { %s3806_s27 = scalar_select %p3221_p6, 1, 0 }
  0x1e   : > { %s2798_s13 = scalar_lea.hbm %s3807_s3, 512  ;;  %p3235_p8 = pneg %p3221_p6 }
  0x1f   : > { %p2799_p7 = scmp.ne.s32.totalorder %s3807_s3, %s2798_s13  ;;  %p2805_p11 = scmp.lt.u32.totalorder %s2798_s13, %s3807_s3 }
  0x20   : > { %s3808_s16 = scalar_select %p3235_p8, 1, 0 }
  0x21   : > { %p2801_p9 = pnand %p3235_p8, %p2799_p7 }
  0x23   : > { %p2802_p10 = pneg %p2801_p9 }
  0x25   : > { %p2807_p12 = pnand %p2805_p11, %p2802_p10 }
  0x27   : > { %2810 = shalt.err (!%p2807_p12)
}
  0x28   : > { %s2811_s30 = scalar_lea.vmem %s3214_s26, 512  ;;  %p2819_p4 = scmp.lt.s32.totalorder %s3214_s26, %s3214_s26 }
  0x29   : > { %p2812_p13 = scmp.ne.s32.totalorder %s3214_s26, %s2811_s30  ;;  %p2820_p5 = scmp.lt.s32.totalorder %s2811_s30, %s2811_s30 }
  0x2b   : > { %p2814_p0 = pnand %p2812_p13, %p3235_p8  ;;  %p2821_p7 = por %p2820_p5, %p2819_p4 }
  0x2d   : > { %p2815_p2 = pneg %p2814_p0 }
  0x2f   : > { %p2822_p9 = pnand %p2821_p7, %p2815_p2 }
  0x31   : > { %2825 = shalt.err (!%p2822_p9)
}
  0x32   : > { %s3772_s12 = smov 128   ;;  %s3773_s13 = smov 8  }
  0x33   : > { %2686 = dma.hbm_to_vmem [thread:$0]  (!%p3221_p6), %s3807_s3, 512, %s3214_s26, [#allocation11], %s3772_s12, %s3772_s12, %s3773_s13  }
  0x34   : > { %s3809_s7 = sld [smem:[#allocation32_spill]] }
  0x3a   : > { %s2826_s30 = scalar_lea.hbm %s3809_s7, 512 }
  0x3b   : > { %p2827_p5 = scmp.ne.s32.totalorder %s3809_s7, %s2826_s30  ;;  %p2833_p12 = scmp.lt.u32.totalorder %s2826_s30, %s3809_s7 }
  0x3d   : > { %p2829_p10 = pnand %p2827_p5, %p3235_p8 }
  0x3f   : > { %p2830_p11 = pneg %p2829_p10 }
  0x41   : > { %p2835_p13 = pnand %p2833_p12, %p2830_p11 }
  0x43   : > { %2838 = shalt.err (!%p2835_p13)
}
  0x44   : > { %s2839_s26 = scalar_lea.vmem %s3225_s29, 512  ;;  %p2847_p7 = scmp.lt.s32.totalorder %s3225_s29, %s3225_s29 }
  0x45   : > { %p2840_p0 = scmp.ne.s32.totalorder %s3225_s29, %s2839_s26  ;;  %p2848_p9 = scmp.lt.s32.totalorder %s2839_s26, %s2839_s26 }
  0x47   : > { %p2842_p2 = pnand %p2840_p0, %p3235_p8  ;;  %p2849_p5 = por %p2848_p9, %p2847_p7 }
  0x49   : > { %p2843_p4 = pneg %p2842_p2 }
  0x4b   : > { %p2850_p10 = pnand %p2849_p5, %p2843_p4 }
  0x4d   : > { %2853 = shalt.err (!%p2850_p10)
}
  0x4e   : > { %2692 = dma.hbm_to_vmem [thread:$0]  (!%p3221_p6), %s3809_s7, 512, %s3225_s29, [#allocation14], %s3772_s12, %s3772_s12, %s3773_s13  }
  0x4f   : > { %s2454_s11 = sadd.s32 4294967294, %s3094_s22   ;;  %s44_s20 = sadd.s32 1, %s3090_s21 }
  0x50   : > { %p46_p11 = scmp.ge.s32.totalorder %s44_s20, 2  ;;  %s51_s14 = sadd.s32 1, %s3082_s19 }
  0x51   : > { %p58_p12 = scmp.ne.s32.totalorder %s3082_s19, %s3078_s18  ;;  %p59_p13 = scmp.eq.s32.totalorder %s3094_s22, 0 }
  0x52   : > { %s3853_s20 = smov (%p46_p11, %s44_s20), 0  ;;  %p64_p2 = scmp.ne.s32.totalorder %s3078_s18, %s3074_s17 }
  0x53   : > { %3810 = sst [smem:[#allocation26_spill]] %s3853_s20  ;;  %p3293_p0 = por %p59_p13, %p58_p12 }
  0x54   : > { %s48_s29 = ssub.s32 %s3090_s21, %s3853_s20  ;;  %p312_p4 = scmp.eq.s32.totalorder %s3205_s23, 1 }
  0x55   : > { %p49_p7 = scmp.eq.s32.totalorder %s48_s29, 0  ;;  %p3304_p9 = por %p3779_p1, %p64_p2 }
  0x56   : > { %p3308_p5 = por %p312_p4, %p58_p12  ;;  %p318_p10 = scmp.eq.s32.totalorder %s2454_s11, 1 }
  0x57   : > { %s3812_s25 = scalar_select %p3304_p9, 1, 0 }
  0x58   : > { %s3813_s28 = scalar_select %p3308_p5, 1, 0 }
  0x59   : > { %s3313_s30 = scalar_select %p49_p7, %s3082_s19, %s51_s14  }
  0x5a   : > { %3814 = sst [smem:[#allocation27_spill]] %s3813_s28  ;;  %p3315_p11 = por %p318_p10, %p64_p2 }
  0x5b   : > { %3815 = sst [smem:[#allocation28_spill]] %s3313_s30  ;;  %p2714_p13 = scmp.lt.s32.totalorder %s3094_s22, 2 }
  0x5c   : > { %s3816_s26 = scalar_select %p3315_p11, 1, 0 }
  0x5d   : > { %s3774_s9 = sand.u32 1, %s3082_s19   ;;  %s3322_s10 = sshll.u32 %s3090_s21, 7 }
  0x5e   : > { %3817 = sst [smem:[#allocation29_spill]] %s3816_s26  ;;  %s3326_s29 = sshll.u32 %s3774_s9, 3 }
  0x5f   : > { %p3330_p12 = pnand %p2714_p13, %p3293_p0  ;;  %s418_s11 = sand.u32 1, %s3094_s22  }
  0x60   : > { %s3819_s1 = sld [smem:[#allocation30_spill]]  ;;  %s422_s7 = scalar_lea.vmem [#allocation7], %s3326_s29 }
  0x61   : > { %s3818_s12 = scalar_select %p3330_p12, 1, 0 }
  0x62   : > { %s430_s9 = sshll.u32 %s422_s7, 4  ;;  %s3344_s15 = scalar_lea.sflag [#allocation8], %s418_s11  ;;  %s3342_s9 = int_to_ptr.vmem [resolvable:$true] %s430_s9 }
  0x63   : > { %p3350_p2 = pneg %p3330_p12 }
  0x65   : > { %s3820_s21 = scalar_select %p3350_p2, 1, 0 }
  0x66   : > { %s3339_s3 = scalar_lea.hbm %s3819_s1, %s3322_s10  ;;  %s2859_s30 = scalar_lea.hbm %s3819_s1, 256 }
  0x67   : > { %s2854_s20 = scalar_lea.hbm %s3339_s3, 128  ;;  %p2860_p10 = scmp.lt.u32.totalorder %s3339_s3, %s3819_s1 }
  0x68   : > { %p2855_p0 = scmp.ne.s32.totalorder %s3339_s3, %s2854_s20  ;;  %p2861_p13 = scmp.lt.u32.totalorder %s2859_s30, %s2854_s20 }
  0x69   : > { %p2863_p11 = scmp.lt.u32.totalorder %s2854_s20, %s3339_s3 }
  0x6a   : > { %p2857_p4 = pnand %p3350_p2, %p2855_p0  ;;  %p2862_p1 = por %p2861_p13, %p2860_p10 }
  0x6c   : > { %p2858_p7 = pneg %p2857_p4  ;;  %p2864_p5 = por %p2863_p11, %p2862_p1 }
  0x6e   : > { %p2865_p9 = pnand %p2864_p5, %p2858_p7 }
  0x70   : > { %2868 = shalt.err (!%p2865_p9)
}
  0x71   : > { %s2869_s11 = scalar_lea.vmem %s3342_s9, 128  ;;  %s3100_s13 = smov [#allocation7]  }
  0x72   : > { %p2870_p0 = scmp.ne.s32.totalorder %s3342_s9, %s2869_s11  ;;  %s2874_s14 = sshll.u32 %s3100_s13, 4  ;;  %s2875_s14 = int_to_ptr.vmem [resolvable:$false] %s2874_s14 }
  0x73   : > { %s2876_s22 = scalar_lea.vmem %s2875_s14, 256  ;;  %p2877_p6 = scmp.lt.s32.totalorder %s3342_s9, %s2875_s14 }
  0x74   : > { %p2872_p4 = pnand %p2870_p0, %p3350_p2  ;;  %p2878_p8 = scmp.lt.s32.totalorder %s2876_s22, %s2869_s11 }
  0x76   : > { %p2873_p3 = pneg %p2872_p4  ;;  %p2879_p10 = por %p2878_p8, %p2877_p6 }
  0x78   : > { %p2880_p13 = pnand %p2879_p10, %p2873_p3 }
  0x7a   : > { %2883 = shalt.err (!%p2880_p13)
}
  0x7b   : > { %2702 = dma.hbm_to_vmem [thread:$0]  (!%p3330_p12), %s3339_s3, 128, %s3342_s9, %s3344_s15  }
  0x7c   : > { %s3101_s20 = smov [#allocation12]   ;;  %s3102_s7 = smov [#allocation15]  }
  0x7d   : > { %s353_s30 = sshll.u32 %s3101_s20, 4  ;;  %s383_s1 = sshll.u32 %s3102_s7, 4  ;;  %s354_s30 = int_to_ptr.vmem [resolvable:$true] %s353_s30  ;;  %s384_s1 = int_to_ptr.vmem [resolvable:$true] %s383_s1 }
  0x7e   : > { %s2884_s14 = scalar_lea.hbm %s3763_s5, 512  ;;  %p3821_p3 = scmp.ne.s32.totalorder %s3808_s16, 0 }
  0x7f   : > { %p2885_p1 = scmp.ne.s32.totalorder %s3763_s5, %s2884_s14  ;;  %p2891_p9 = scmp.lt.u32.totalorder %s2884_s14, %s3763_s5 }
  0x81   : > { %p2887_p6 = pnand %p2885_p1, %p3821_p3 }
  0x83   : > { %p2888_p8 = pneg %p2887_p6 }
  0x85   : > { %p2893_p5 = pnand %p2891_p9, %p2888_p8 }
  0x87   : > { %2896 = shalt.err (!%p2893_p5)
}
  0x88   : > { %s2897_s3 = scalar_lea.vmem %s354_s30, 512  ;;  %p2905_p4 = scmp.lt.s32.totalorder %s354_s30, %s354_s30 }
  0x89   : > { %p2898_p11 = scmp.ne.s32.totalorder %s354_s30, %s2897_s3  ;;  %p2906_p10 = scmp.lt.s32.totalorder %s2897_s3, %s2897_s3 }
  0x8b   : > { %p2900_p7 = pnand %p2898_p11, %p3821_p3  ;;  %p2907_p13 = por %p2906_p10, %p2905_p4 }
  0x8d   : > { %p2901_p0 = pneg %p2900_p7 }
  0x8f   : > { %p2908_p12 = pnand %p2907_p13, %p2901_p0 }
  0x91   : > { %2911 = shalt.err (!%p2908_p12)
}
  0x92   : > { %p3822_p1 = scmp.ne.s32.totalorder %s3806_s27, 0  ;;  %s3823_s26 = smov 8  }
  0x93   : > { %s3824_s9 = smov 128   ;;  %s2912_s13 = scalar_lea.hbm %s3766_s8, 16 }
  0x94   : > { %2689 = dma.hbm_to_vmem [thread:$0]  (!%p3822_p1), %s3763_s5, 512, %s354_s30, [#allocation11], %s3824_s9, %s3824_s9, %s3823_s26  }
  0x95   : > { %p2913_p6 = scmp.ne.s32.totalorder %s3766_s8, %s2912_s13  ;;  %p2919_p9 = scmp.lt.u32.totalorder %s2912_s13, %s3766_s8 }
  0x97   : > { %p2915_p12 = pnand %p2913_p6, %p3821_p3 }
  0x99   : > { %p2916_p8 = pneg %p2915_p12 }
  0x9b   : > { %p2921_p5 = pnand %p2919_p9, %p2916_p8 }
  0x9d   : > { %2924 = shalt.err (!%p2921_p5)
}
  0x9e   : > { %s2925_s17 = scalar_lea.vmem %s384_s1, 16  ;;  %s2932_s30 = scalar_lea.vmem %s384_s1, 32 }
  0x9f   : > { %p2926_p11 = scmp.ne.s32.totalorder %s384_s1, %s2925_s17  ;;  %p2933_p4 = scmp.lt.s32.totalorder %s384_s1, %s384_s1 }
  0xa0   : > { %p2934_p10 = scmp.lt.s32.totalorder %s2932_s30, %s2925_s17 }
  0xa1   : > { %p2928_p7 = pnand %p2926_p11, %p3821_p3 }
  0xa2   : > { %p2935_p13 = por %p2934_p10, %p2933_p4 }
  0xa3   : > { %p2929_p0 = pneg %p2928_p7 }
  0xa5   : > { %p2936_p2 = pnand %p2935_p13, %p2929_p0 }
  0xa7   : > { %2939 = shalt.err (!%p2936_p2)
}
  0xa8   : > { %2695 = dma.hbm_to_vmem [thread:$0]  (!%p3822_p1), %s3766_s8, 16, %s384_s1, [#allocation14]  }
  0xa9   : > { %s3417_s20 = scalar_lea.hbm %s3758_s0, %s3322_s10  ;;  %s404_s7 = scalar_lea.vmem [#allocation4], %s3326_s29 }
  0xaa   : > { %s411_s27 = sshll.u32 %s404_s7, 4  ;;  %s3426_s11 = scalar_lea.hbm %s3760_s2, %s3322_s10  ;;  %s3420_s27 = int_to_ptr.vmem [resolvable:$true] %s411_s27 }
  0xab   : > { %s3825_s22 = sand.u32 1, %s3082_s19   ;;  %s2940_s3 = scalar_lea.hbm %s3417_s20, 128 }
  0xac   : > { %s401_s1 = scalar_lea.sflag [#allocation5], %s3825_s22  ;;  %p2941_p2 = scmp.ne.s32.totalorder %s3417_s20, %s2940_s3 }
  0xad   : > { %p3826_p3 = scmp.ne.s32.totalorder %s3820_s21, 0  ;;  %s2945_s26 = scalar_lea.hbm %s3758_s0, 256 }
  0xae   : > { %p2946_p12 = scmp.lt.u32.totalorder %s3417_s20, %s3758_s0  ;;  %p2947_p8 = scmp.lt.u32.totalorder %s2945_s26, %s2940_s3 }
  0xaf   : > { %p2943_p1 = pnand %p2941_p2, %p3826_p3  ;;  %p2949_p5 = scmp.lt.u32.totalorder %s2940_s3, %s3417_s20 }
  0xb0   : > { %p2948_p9 = por %p2947_p8, %p2946_p12 }
  0xb1   : > { %p2944_p6 = pneg %p2943_p1 }
  0xb2   : > { %p2950_p11 = por %p2949_p5, %p2948_p9 }
  0xb4   : > { %p2951_p7 = pnand %p2950_p11, %p2944_p6 }
  0xb6   : > { %2954 = shalt.err (!%p2951_p7)
}
  0xb7   : > { %s2955_s10 = scalar_lea.vmem %s3420_s27, 128  ;;  %s3103_s28 = smov [#allocation4]  }
  0xb8   : > { %p2956_p0 = scmp.ne.s32.totalorder %s3420_s27, %s2955_s10  ;;  %s2960_s7 = sshll.u32 %s3103_s28, 4  ;;  %s2961_s7 = int_to_ptr.vmem [resolvable:$false] %s2960_s7 }
  0xb9   : > { %s2962_s13 = scalar_lea.vmem %s2961_s7, 256  ;;  %p2963_p13 = scmp.lt.s32.totalorder %s3420_s27, %s2961_s7 }
  0xba   : > { %p2958_p4 = pnand %p2956_p0, %p3826_p3  ;;  %p2964_p2 = scmp.lt.s32.totalorder %s2962_s13, %s2955_s10 }
  0xbc   : > { %p2959_p10 = pneg %p2958_p4  ;;  %p2965_p1 = por %p2964_p2, %p2963_p13 }
  0xbe   : > { %p2966_p12 = pnand %p2965_p1, %p2959_p10 }
  0xc0   : > { %2969 = shalt.err (!%p2966_p12)
}
  0xc1   : > { %p3827_p6 = scmp.ne.s32.totalorder %s3818_s12, 0  ;;  %s441_s14 = scalar_lea.vmem [#allocation9], %s3326_s29 }
  0xc2   : > { %s449_s22 = sshll.u32 %s441_s14, 4  ;;  %s2970_s3 = scalar_lea.hbm %s3426_s11, 128  ;;  %s450_s22 = int_to_ptr.vmem [resolvable:$true] %s449_s22 }
  0xc3   : > { %2699 = dma.hbm_to_vmem [thread:$0]  (!%p3827_p6), %s3417_s20, 128, %s3420_s27, %s401_s1  }
  0xc4   : > { %p2971_p8 = scmp.ne.s32.totalorder %s3426_s11, %s2970_s3  ;;  %s2975_s26 = scalar_lea.hbm %s3760_s2, 256 }
  0xc5   : > { %p2976_p11 = scmp.lt.u32.totalorder %s3426_s11, %s3760_s2  ;;  %p2977_p7 = scmp.lt.u32.totalorder %s2975_s26, %s2970_s3 }
  0xc6   : > { %p2973_p9 = pnand %p2971_p8, %p3826_p3  ;;  %p2979_p4 = scmp.lt.u32.totalorder %s2970_s3, %s3426_s11 }
  0xc7   : > { %p2978_p0 = por %p2977_p7, %p2976_p11 }
  0xc8   : > { %p2974_p5 = pneg %p2973_p9 }
  0xc9   : > { %p2980_p10 = por %p2979_p4, %p2978_p0 }
  0xcb   : > { %p2981_p13 = pnand %p2980_p10, %p2974_p5 }
  0xcd   : > { %2984 = shalt.err (!%p2981_p13)
}
  0xce   : > { %s2985_s29 = scalar_lea.vmem %s450_s22, 128  ;;  %s3104_s20 = smov [#allocation9]  }
  0xcf   : > { %p2986_p2 = scmp.ne.s32.totalorder %s450_s22, %s2985_s29  ;;  %s2990_s27 = sshll.u32 %s3104_s20, 4  ;;  %s2991_s27 = int_to_ptr.vmem [resolvable:$false] %s2990_s27 }
  0xd0   : > { %s2992_s1 = scalar_lea.vmem %s2991_s27, 256  ;;  %p2993_p8 = scmp.lt.s32.totalorder %s450_s22, %s2991_s27 }
  0xd1   : > { %p2988_p1 = pnand %p2986_p2, %p3826_p3  ;;  %p2994_p9 = scmp.lt.s32.totalorder %s2992_s1, %s2985_s29 }
  0xd3   : > { %p2989_p12 = pneg %p2988_p1  ;;  %p2995_p6 = por %p2994_p9, %p2993_p8 }
  0xd5   : > { %p2996_p7 = pnand %p2995_p6, %p2989_p12 }
  0xd7   : > { %2999 = shalt.err (!%p2996_p7)
}
  0xd8   : > { %p3828_p11 = scmp.ne.s32.totalorder %s3818_s12, 0  ;;  %p3829_p5 = scmp.ne.s32.totalorder %s3805_s24, 0 }
  0xd9   : > { %s3473_s21 = sand.u32 (!%p3829_p5), 1, %s3078_s18   ;;  %p3830_p3 = scmp.ne.s32.totalorder (!%p3829_p5), %s3812_s25, 0 }
  0xda   : > { %2705 = dma.hbm_to_vmem [thread:$0]  (!%p3828_p11), %s3426_s11, 128, %s450_s22, %s3344_s15  }
  0xdb   : > { %458 = sbr.rel (%p3829_p5) target bundleno = 1337 (0x539), region = 64  ;;  %s3476_s10 = sshll.u32 (!%p3829_p5), %s3473_s21, 3 }
  0xdc   : > { %s461_s28 = scalar_lea.sflag (!%p3829_p5), [#allocation5], %s3473_s21  ;;  %s464_s7 = scalar_lea.vmem (!%p3829_p5), [#allocation4], %s3476_s10 }
  0xe2   : > { %3053 = dma.done.wait (%p3830_p3), %s461_s28, 128  }
  0xe3   : > { %3055 = vsyncadd (%p3830_p3), %s461_s28, 4294967168  ;;  %s469_s24 = sand.u32 1, %s3205_s23   ;;  %s473_s15 = scalar_lea.vmem [#allocation7], %s3476_s10 }
  0xe4   : > { %s470_s12 = scalar_lea.sflag [#allocation8], %s469_s24 }
  0xe5   : > { %3057 = dma.done.wait (%p3830_p3), %s470_s12, 256  }
  0xe6   : > { %3059 = vsyncadd (%p3830_p3), %s470_s12, 4294967040  ;;  %s482_s11 = scalar_lea.vmem [#allocation9], %s3476_s10  ;;  %p3831_p6 = scmp.eq.s32.totalorder %s3205_s23, 0 }
  0xe8   : > { %3061 = dma.done.wait (%p3831_p6), [#allocation11], 1024   ;;  %p3832_p0 = pmov %p3831_p6 }
  0xea   : > { %3063 = vsyncadd (%p3832_p0), [#allocation11], 4294966272  ;;  %p3833_p4 = pmov %p3832_p0 }
  0xeb   : > { %p3834_p10 = pmov %p3832_p0 }
  0xec   : > { %3065 = dma.done.wait (%p3833_p4), [#allocation14], 528  }
  0xed   : > { %3067 = vsyncadd (%p3834_p10), [#allocation14], 4294966768  ;;  %v3105_v0 = vmov 0.0|0.0   ;;  %vm3106_vm0 = vmmov 0   ;;  %v3107_v1 = vmov 0.0   ;;  %v552_v2 = vld [vmem:[#allocation10] sm:$0xff]  ;;  %v653_v38 = vlaneseq }
  0xee   : > { %2641 = vmatprep.subr.bf16.mxu0 %v3105_v0  ;;  %2647 = vmatprep.subr.bf16.mxu1 %v3105_v0  ;;  %v553_v3 = vld [vmem:[#allocation10 + $0x8] sm:$0xff]  ;;  %v554_v4 = vld [vmem:[#allocation10 + $0x10] sm:$0xff]  ;;  %v555_v6 = vld [vmem:[#allocation10 + $0x18] sm:$0xff]  ;;  %vm563_vm1 = vcmask 261120   ;;  %vm784_vm2 = vcmask 64512   ;;  %s3108_s22 = smov 104  }
  0xef   : > { %2556 = vmatprep.mubr.msk.f32.mxu0 %vm3106_vm0, %v3107_v1  ;;  %2567 = vmatprep.mubr.msk.f32.mxu1 %vm3106_vm0, %v3107_v1  ;;  %v2642_v5 = vpack.c.bf16 %v553_v3, %v552_v2  ;;  %v795_v7 = vld [vmem:[#allocation12] sm:$0xff]  ;;  %v796_v8 = vld [vmem:[#allocation12 + $0x8] sm:$0xff]  ;;  %v797_v10 = vld [vmem:[#allocation12 + $0x10] sm:$0xff]  ;;  %v2645_v12 = vpack.c.bf16 %v555_v6, %v554_v4  ;;  %789 = vst.msk [vmem:[#allocation3] sm:$0xff] %vm784_vm2, %v3107_v1  ;;  %s3109_s3 = smov 120   ;;  %s3110_s17 = smov 112  }
  0xf0   : > { %v2648_v9 = vpack.c.bf16 %v796_v8, %v795_v7  ;;  %v798_v11 = vld [vmem:[#allocation12 + $0x18] sm:$0xff]  ;;  %v880_v14 = vld [vmem:[#allocation13] sm:$0xff]  ;;  %v881_v15 = vld [vmem:[#allocation13 + $0x8] sm:$0xff]  ;;  %790 = vst.msk [vmem:[#allocation3 + $0x8] sm:$0xff] %vm784_vm2, %v3107_v1  ;;  %v3111_v36 = vmov 1983009808  }
  0xf1   : > { %2643 = vmatpush3.bf16.msra.mxu0 %v2642_v5  ;;  %v2651_v13 = vpack.c.bf16 %v798_v11, %v797_v10  ;;  %v551_v16 = vld [vmem:[%s464_s7] sm:$0xff]  ;;  %v2654_v17 = vpack.c.bf16 %v881_v15, %v880_v14  ;;  %v793_v18 = vld [vmem:[%s473_s15] sm:$0xff]  ;;  %791 = vst.msk [vmem:[#allocation3 + $0x10] sm:$0xff] %vm784_vm2, %v3107_v1  ;;  %792 = vst.msk [vmem:[#allocation3 + $0x18] sm:$0xff] %vm784_vm2, %v3107_v1  ;;  %v651_v37 = vunpack.c.l.s4 %v3111_v36  ;;  %v3112_v39 = vmov 1934713408  }
  0xf2   : > { %2644 = vmatprep.subr.bf16.mxu0 %v3105_v0  ;;  %2649 = vmatpush3.bf16.msra.mxu1 %v2648_v9  ;;  %v882_v19 = vld [vmem:[#allocation13 + $0x10] sm:$0xff]  ;;  %v883_v20 = vld [vmem:[#allocation13 + $0x18] sm:$0xff]  ;;  %v2482_v32 = vld [vmem:[#allocation15] ss:$0 sm:$0xff]  ;;  %v683_v40 = vunpack.c.l.s4 %v3112_v39  ;;  %v3540_v42 = vshrl.u32 %v653_v38, 7  ;;  %s3835_s9 = sld [smem:[#allocation33_spill]] }
  0xf3   : > { %2650 = vmatprep.subr.bf16.mxu1 %v3105_v0  ;;  %v2657_v21 = vpack.c.bf16 %v883_v20, %v882_v19  ;;  %v794_v22 = vld [vmem:[%s482_s11] sm:$0xff]  ;;  %v652_v41 = vunpack.c.0.s8 %v651_v37  ;;  %s3836_s7 = sld [smem:[#allocation23_spill]]  ;;  %s3837_s24 = sld [smem:[#allocation27_spill]] }
  0xf4   : > { %v2476_v23 = vld [vmem:[%s3762_s4] ss:$0 sm:$0xff]  ;;  %v684_v45 = vunpack.c.0.s8 %v683_v40  ;;  %s3838_s11 = sld [smem:[#allocation34_spill]]  ;;  %s546_s25 = scalar_lea.vmem [#allocation16], %s3476_s10 }
  0xf5   : > { %2646 = vmatpush3.bf16.msra.mxu0 %v2645_v12  ;;  %v2480_v28 = vld [vmem:[%s3764_s6] ss:$0 sm:$0xff]  ;;  %v3543_v46 = vsub.s32 %v652_v41, %v3540_v42  ;;  %s2292_s13 = sshll.u32 %s546_s25, 4  ;;  %s2279_s30 = scalar_lea.sflag [#allocation6], %s3473_s21  ;;  %s3710_s13 = int_to_ptr.vmem [resolvable:$true] %s2292_s13 }
  0xf6   : > { %2652 = vmatpush3.bf16.msra.mxu1 %v2651_v13  ;;  %2653 = vmatprep.subr.bf16.mxu0 %v3105_v0  ;;  %v3546_v53 = vsub.s32 %v684_v45, %v3540_v42  ;;  %s3000_s26 = scalar_lea.vmem %s3710_s13, 128  ;;  %s3113_s10 = smov [#allocation16]  }
  0xf7   : > { %2581 = vmatprep.subr.mxu1 %v3107_v1  ;;  %p3001_p13 = scmp.ne.s32.totalorder %s3710_s13, %s3000_s26  ;;  %s3004_s16 = sshll.u32 %s3113_s10, 4  ;;  %s3005_s16 = int_to_ptr.vmem [resolvable:$false] %s3004_s16 }
  0xf8   : > { %2557 = vmatmul.mubr.msk.f32.vlgmr.msra.gmra.mrb[0].mxu0 %vm563_vm1, %v551_v16  ;;  %s3006_s29 = scalar_lea.vmem %s3005_s16, 256  ;;  %p3007_p8 = scmp.lt.s32.totalorder %s3710_s13, %s3005_s16 }
  0xf9   : > { %2568 = vmatmul.mubr.msk.f32.vlgmr.msra.gmra.mrb[0].mxu1 %vm563_vm1, %v793_v18  ;;  %2655 = vmatpush3.bf16.msra.mxu0 %v2654_v17  ;;  %s2506_s23 = sshll.u32 %s3836_s7, 7  ;;  %p3840_p2 = scmp.ne.s32.totalorder %s3837_s24, 0 }
  0xfa   : > { %2656 = vmatprep.subr.bf16.mxu0 %v3105_v0  ;;  %2578 = vmatprep.mubr.msk.f32.mxu0 %vm3106_vm0, %v3107_v1  ;;  %p3008_p9 = scmp.lt.s32.totalorder %s3006_s29, %s3000_s26 }
  0xfb   : > { %2583 = vmatprep.mubr.msk.f32.mxu1 %vm3106_vm0, %v3107_v1  ;;  %p3002_p1 = pnand %p3001_p13, %p3840_p2 }
  0xfc   : > { %p3009_p7 = por %p3008_p9, %p3007_p8 }
  0xfd   : > { %2658 = vmatpush3.bf16.msra.mxu0 %v2657_v21  ;;  %p3003_p12 = pneg %p3002_p1 }
  0xfe   : > { %2591 = vmatprep.subr.mxu0 %v3107_v1 }
  0xff   : > { %p3010_p11 = pnand %p3009_p7, %p3003_p12 }
 0x100   : > { %2579 = vmatmul.mubr.msk.f32.vlgmr.msra.gmra.mrb[2].mxu0 %vm563_vm1, %v794_v22 }
 0x101   : > { %2593 = vmatprep.mubr.msk.f32.mxu0 %vm3106_vm0, %v3107_v1 }
 0x1cb   : > { %v633_v24 = vpop.f32.mrb[0].mxu0 }
 0x1cc   : > { %v634_v25 = vadd.f32 %v2476_v23, %v633_v24  ;;  %v2558_v26 = vpop.f32.mrb[1].mxu0  ;;  %v876_v27 = vpop.f32.mrb[0].mxu1 }
 0x1cd   : > { %v2569_v29 = vpop.f32.mrb[1].mxu1  ;;  %v877_v31 = vadd.f32 %v2480_v28, %v876_v27 }
 0x1ce   : > { %v637_v30 = vmul.f32 0.35355338, %v634_v25 }
 0x1d0   : > { %645 = vrot.lane.b32.xlu1 %v637_v30, %s3108_s22  ;;  %639 = vrot.lane.b32.xlu0 %v637_v30, %s3109_s3 }
 0x1d3   : > { %v960_v33 = vpop.f32.mrb[2].mxu0 }
 0x1d4   : > { %965 = vrot.lane.b32.xlu1 %v877_v31, %s3109_s3  ;;  %642 = vrot.lane.b32.xlu0 %v637_v30, %s3110_s17  ;;  %v3534_v34 = vadd.f32 %v2482_v32, %v960_v33  ;;  %v2580_v35 = vpop.f32.mrb[3].mxu0 }
 0x1d8   : > { %971 = vrot.lane.b32.xlu1 %v877_v31, %s3108_s22  ;;  %968 = vrot.lane.b32.xlu0 %v877_v31, %s3110_s17 }
 0x1dc   : > { %1111 = vrot.lane.b32.xlu0 %v3534_v34, %s3109_s3  ;;  %1114 = vrot.lane.b32.xlu1 %v3534_v34, %s3110_s17  ;;  %s3839_s3 = sld [smem:[#allocation35_spill]] }
 0x1e0   : > { %1117 = vrot.lane.b32.xlu0 %v3534_v34, %s3108_s22 }
 0x1e2   : > { %s3708_s17 = scalar_lea.hbm %s3839_s3, %s2506_s23 }
 0x242   : > { %v646_v43 = vpop.permute.xlu1 %645  ;;  %v640_v44 = vpop.permute.xlu0 %639 }
 0x243   : > { %v664_v47 = vcombine.low %v640_v44, %v646_v43  ;;  %v665_v48 = vcombine.high %v640_v44, %v646_v43 }
 0x245   : > { %v672_v54 = vrot.slane %v664_v47, %v3543_v46  ;;  %v679_v55 = vrot.slane %v665_v48, %v3543_v46 }
 0x246   : > { %v966_v49 = vpop.permute.xlu1 %965  ;;  %v643_v50 = vpop.permute.xlu0 %642 }
 0x247   : > { %v648_v51 = vcombine.low %v637_v30, %v643_v50  ;;  %v649_v52 = vcombine.high %v637_v30, %v643_v50 }
 0x249   : > { %v656_v56 = vrot.slane %v648_v51, %v3543_v46  ;;  %v663_v57 = vrot.slane %v649_v52, %v3543_v46 }
 0x24a   : > { %v972_v58 = vpop.permute.xlu1 %971  ;;  %v969_v59 = vpop.permute.xlu0 %968 }
 0x24b   : > { %v680_v60 = vcombine.low %v656_v56, %v672_v54  ;;  %v681_v61 = vcombine.high %v656_v56, %v672_v54  ;;  %v696_v62 = vcombine.low %v663_v57, %v679_v55  ;;  %v697_v63 = vcombine.high %v663_v57, %v679_v55 }
 0x24c   : > { %v990_v0 = vcombine.low %v966_v49, %v972_v58  ;;  %v991_v2 = vcombine.high %v966_v49, %v972_v58  ;;  %v974_v3 = vcombine.low %v877_v31, %v969_v59  ;;  %v975_v4 = vcombine.high %v877_v31, %v969_v59 }
 0x24d   : > { %v688_v5 = vrot.slane %v680_v60, %v3546_v53  ;;  %v695_v6 = vrot.slane %v681_v61, %v3546_v53  ;;  %v704_v7 = vrot.slane %v696_v62, %v3546_v53  ;;  %v711_v8 = vrot.slane %v697_v63, %v3546_v53 }
 0x24e   : > { %v998_v9 = vrot.slane %v990_v0, %v3543_v46  ;;  %v1005_v10 = vrot.slane %v991_v2, %v3543_v46  ;;  %v982_v11 = vrot.slane %v974_v3, %v3543_v46  ;;  %v989_v12 = vrot.slane %v975_v4, %v3543_v46  ;;  %v1112_v62 = vpop.permute.xlu0 %1111  ;;  %v1115_v63 = vpop.permute.xlu1 %1114 }
 0x24f   : > { %v716_v13 = vcombine.low %v688_v5, %v695_v6  ;;  %v2478_v14 = vcombine.high %v688_v5, %v695_v6  ;;  %v732_v15 = vcombine.low %v704_v7, %v711_v8  ;;  %v2479_v16 = vcombine.high %v704_v7, %v711_v8 }
 0x250   : > { %v1006_v17 = vcombine.low %v982_v11, %v998_v9  ;;  %v1007_v18 = vcombine.high %v982_v11, %v998_v9  ;;  %v1022_v19 = vcombine.low %v989_v12, %v1005_v10  ;;  %v1023_v20 = vcombine.high %v989_v12, %v1005_v10 }
 0x251   : > { %v723_v21 = vrot.slane %v716_v13, %v3543_v46  ;;  %v731_v22 = vrot.slane %v2478_v14, %v3543_v46  ;;  %v739_v23 = vrot.slane %v732_v15, %v3543_v46  ;;  %v747_v24 = vrot.slane %v2479_v16, %v3543_v46 }
 0x252   : > { %v1014_v25 = vrot.slane %v1006_v17, %v3546_v53  ;;  %v1021_v26 = vrot.slane %v1007_v18, %v3546_v53  ;;  %v1030_v27 = vrot.slane %v1022_v19, %v3546_v53  ;;  %v1037_v28 = vrot.slane %v1023_v20, %v3546_v53  ;;  %v1118_v6 = vpop.permute.xlu0 %1117 }
 0x253   : > { %v748_v29 = vcombine.low %v723_v21, %v731_v22  ;;  %v749_v30 = vcombine.high %v723_v21, %v731_v22  ;;  %v764_v31 = vcombine.low %v739_v23, %v747_v24  ;;  %v765_v32 = vcombine.high %v739_v23, %v747_v24 }
 0x254   : > { %v1042_v33 = vcombine.low %v1014_v25, %v1021_v26  ;;  %v2484_v35 = vcombine.high %v1014_v25, %v1021_v26  ;;  %v1058_v36 = vcombine.low %v1030_v27, %v1037_v28  ;;  %v2485_v37 = vcombine.high %v1030_v27, %v1037_v28 }
 0x255   : > { %v756_v39 = vrot.slane %v748_v29, %v3546_v53  ;;  %v763_v40 = vrot.slane %v749_v30, %v3546_v53  ;;  %v772_v41 = vrot.slane %v764_v31, %v3546_v53  ;;  %v779_v43 = vrot.slane %v765_v32, %v3546_v53 }
 0x256   : > { %v1049_v44 = vrot.slane %v1042_v33, %v3543_v46  ;;  %v1057_v45 = vrot.slane %v2484_v35, %v3543_v46  ;;  %v1065_v47 = vrot.slane %v1058_v36, %v3543_v46  ;;  %v1073_v48 = vrot.slane %v2485_v37, %v3543_v46 }
 0x257   : > { %v780_v49 = vcombine.low %v756_v39, %v772_v41  ;;  %v781_v50 = vcombine.high %v756_v39, %v772_v41  ;;  %v782_v51 = vcombine.low %v763_v40, %v779_v43  ;;  %v783_v52 = vcombine.high %v763_v40, %v779_v43 }
 0x258   : > { %v1074_v54 = vcombine.low %v1049_v44, %v1057_v45  ;;  %v1075_v55 = vcombine.high %v1049_v44, %v1057_v45  ;;  %v1090_v56 = vcombine.low %v1065_v47, %v1073_v48  ;;  %v1091_v57 = vcombine.high %v1065_v47, %v1073_v48 }
 0x259   : > { %785 = vst.msk [vmem:[#allocation2] sm:$0xff] %vm784_vm2, %v780_v49  ;;  %786 = vst.msk [vmem:[#allocation2 + $0x8] sm:$0xff] %vm784_vm2, %v781_v50  ;;  %v1120_v3 = vcombine.low %v3534_v34, %v1115_v63  ;;  %v1121_v4 = vcombine.high %v3534_v34, %v1115_v63  ;;  %v1136_v11 = vcombine.low %v1112_v62, %v1118_v6  ;;  %v1568_v48 = vand.u32 127, %v653_v38 }
 0x25a   : > { %787 = vst.msk [vmem:[#allocation2 + $0x10] sm:$0xff] %vm784_vm2, %v782_v51  ;;  %788 = vst.msk [vmem:[#allocation2 + $0x18] sm:$0xff] %vm784_vm2, %v783_v52  ;;  %v1082_v58 = vrot.slane %v1074_v54, %v3546_v53  ;;  %v1098_v59 = vrot.slane %v1090_v56, %v3546_v53  ;;  %v1089_v60 = vrot.slane %v1075_v55, %v3546_v53 }
 0x25b   : > { %v1105_v61 = vrot.slane %v1091_v57, %v3546_v53  ;;  %v1128_v9 = vrot.slane %v1120_v3, %v3543_v46  ;;  %v1135_v10 = vrot.slane %v1121_v4, %v3543_v46  ;;  %v1137_v12 = vcombine.high %v1112_v62, %v1118_v6 }
 0x25c   : > { %v1106_v0 = vcombine.low %v1082_v58, %v1098_v59  ;;  %v1107_v5 = vcombine.high %v1082_v58, %v1098_v59  ;;  %v1144_v34 = vrot.slane %v1136_v11, %v3543_v46  ;;  %vm1572_vm3 = vcmp.ge.s32.totalorder %v1568_v48, %v3540_v42 }
 0x25d   : > { %v1108_v2 = vcombine.low %v1089_v60, %v1105_v61  ;;  %v1151_v13 = vrot.slane %v1137_v12, %v3543_v46  ;;  %v1109_v14 = vcombine.high %v1089_v60, %v1105_v61 }
 0x25e   : > { %2582 = vmatpush3.xpose.msk.msra.mxu1 %vm784_vm2, %v1106_v0  ;;  %v1152_v16 = vcombine.low %v1128_v9, %v1144_v34  ;;  %v1153_v17 = vcombine.high %v1128_v9, %v1144_v34 }
 0x25f   : > { %2592 = vmatpush3.xpose.msk.msra.mxu0 %vm784_vm2, %v1108_v2  ;;  %2586 = vmatprep.subr.mxu1 %v3107_v1  ;;  %v1168_v18 = vcombine.low %v1135_v10, %v1151_v13  ;;  %v1169_v19 = vcombine.high %v1135_v10, %v1151_v13 }
 0x260   : > { %2601 = vmatprep.subr.mxu0 %v3107_v1  ;;  %v1256_v7 = vld [vmem:[#allocation2] sm:$0xff]  ;;  %v1257_v15 = vld [vmem:[#allocation2 + $0x8] sm:$0xff]  ;;  %v1160_v20 = vrot.slane %v1152_v16, %v3546_v53  ;;  %v1167_v21 = vrot.slane %v1153_v17, %v3546_v53 }
 0x261   : > { %v1258_v8 = vld [vmem:[#allocation2 + $0x10] sm:$0xff]  ;;  %2584 = vmatmul.mubr.msk.f32.vlgmr.msra.gmra.mrb[2].mxu1 %vm784_vm2, %v1256_v7  ;;  %v1176_v22 = vrot.slane %v1168_v18, %v3546_v53  ;;  %v1183_v23 = vrot.slane %v1169_v19, %v3546_v53  ;;  %v1259_v24 = vld [vmem:[#allocation2 + $0x18] sm:$0xff] }
 0x262   : > { %2594 = vmatmul.mubr.msk.f32.vlgmr.msra.gmra.mrb[4].mxu0 %vm784_vm2, %v1258_v8  ;;  %2587 = vmatpush3.xpose.msk.msra.mxu1 %vm784_vm2, %v1107_v5  ;;  %v1188_v25 = vcombine.low %v1160_v20, %v1167_v21  ;;  %v2486_v26 = vcombine.high %v1160_v20, %v1167_v21 }
 0x263   : > { %2588 = vmatprep.mubr.msk.f32.mxu1 %vm3106_vm0, %v3107_v1  ;;  %2596 = vmatprep.subr.mxu1 %v3107_v1  ;;  %v1204_v27 = vcombine.low %v1176_v22, %v1183_v23  ;;  %v2487_v28 = vcombine.high %v1176_v22, %v1183_v23 }
 0x264   : > { %2603 = vmatprep.mubr.msk.f32.mxu0 %vm3106_vm0, %v3107_v1  ;;  %v1195_v29 = vrot.slane %v1188_v25, %v3543_v46  ;;  %v1203_v30 = vrot.slane %v2486_v26, %v3543_v46 }
 0x265   : > { %2589 = vmatmul.mubr.msk.f32.vlgmr.msra.gmra.mrb[4].mxu1 %vm784_vm2, %v1257_v15  ;;  %v1211_v31 = vrot.slane %v1204_v27, %v3543_v46  ;;  %v1219_v32 = vrot.slane %v2487_v28, %v3543_v46 }
 0x266   : > { %2597 = vmatpush3.xpose.msk.msra.mxu1 %vm784_vm2, %v1109_v14  ;;  %2598 = vmatprep.mubr.msk.f32.mxu1 %vm3106_vm0, %v3107_v1  ;;  %v1220_v33 = vcombine.low %v1195_v29, %v1203_v30  ;;  %v1221_v41 = vcombine.high %v1195_v29, %v1203_v30 }
 0x267   : > { %2606 = vmatprep.subr.mxu1 %v3107_v1  ;;  %v1236_v35 = vcombine.low %v1211_v31, %v1219_v32  ;;  %v1237_v43 = vcombine.high %v1211_v31, %v1219_v32 }
 0x268   : > { %v1228_v36 = vrot.slane %v1220_v33, %v3546_v53  ;;  %v3621_v44 = vrot.slane %v1221_v41, %v3546_v53 }
 0x269   : > { %2599 = vmatmul.mubr.msk.f32.vlgmr.msra.gmra.mrb[6].mxu1 %vm784_vm2, %v1259_v24  ;;  %v1244_v37 = vrot.slane %v1236_v35, %v3546_v53  ;;  %v3624_v45 = vrot.slane %v1237_v43, %v3546_v53 }
 0x26a   : > { %2608 = vmatprep.mubr.msk.f32.mxu1 %vm3106_vm0, %v3107_v1 }
 0x26b   : > { %v1252_v39 = vcombine.low %v1228_v36, %v1244_v37  ;;  %v1253_v40 = vcombine.high %v1228_v36, %v1244_v37  ;;  %v1254_v46 = vcombine.low %v3621_v44, %v3624_v45  ;;  %v1255_v47 = vcombine.high %v3621_v44, %v3624_v45  ;;  %v1967_v44 = vld [vmem:[%s3835_s9 + $0x8] sm:$0xff]  ;;  %v1655_v45 = vld [vmem:[#allocation3] sm:$0xff] }
 0x26d   : > { %2602 = vmatpush3.msra.mxu0 %v1252_v39  ;;  %2607 = vmatpush3.msra.mxu1 %v1253_v40 }
 0x26e   : > { %2611 = vmatprep.subr.mxu0 %v3107_v1  ;;  %2616 = vmatprep.subr.mxu1 %v3107_v1 }
 0x334   : > { %v1333_v49 = vpop.f32.mrb[2].mxu1 }
 0x335   : > { %v1485_v50 = vpop.f32.mrb[4].mxu0  ;;  %v1575_v53 = vsel %vm1572_vm3, -1e+09, %v1333_v49  ;;  %v2585_v52 = vpop.f32.mrb[3].mxu1 }
 0x336   : > { %v1577_v51 = vsel %vm1572_vm3, -1e+09, %v1485_v50  ;;  %v2595_v54 = vpop.f32.mrb[5].mxu0  ;;  %v1579_v55 = vsel %vm784_vm2, %v1575_v53, -inf }
 0x337   : > { %v1593_v56 = vsel %vm784_vm2, %v1577_v51, -inf  ;;  %v1580_v57 = vrot.slane %v1579_v55, 4 }
 0x338   : > { %v1594_v58 = vrot.slane %v1593_v56, 4  ;;  %v1409_v59 = vpop.f32.mrb[4].mxu1 }
 0x339   : > { %v1581_v38 = vmax.f32 %v1579_v55, %v1580_v57  ;;  %v1576_v61 = vsel %vm1572_vm3, -1e+09, %v1409_v59  ;;  %v2590_v62 = vpop.f32.mrb[5].mxu1 }
 0x33a   : > { %v1595_v60 = vmax.f32 %v1593_v56, %v1594_v58  ;;  %v1586_v63 = vsel %vm784_vm2, %v1576_v61, -inf }
 0x33b   : > { %v1582_v0 = vrot.slane %v1581_v38, 2  ;;  %v1587_v3 = vrot.slane %v1586_v63, 4 }
 0x33c   : > { %v1596_v2 = vrot.slane %v1595_v60, 2  ;;  %v1561_v4 = vpop.f32.mrb[6].mxu1 }
 0x33d   : > { %v1583_v5 = vmax.f32 %v1581_v38, %v1582_v0  ;;  %v1588_v7 = vmax.f32 %v1586_v63, %v1587_v3  ;;  %v1578_v8 = vsel %vm1572_vm3, -1e+09, %v1561_v4  ;;  %v2600_v9 = vpop.f32.mrb[7].mxu1 }
 0x33e   : > { %v1597_v6 = vmax.f32 %v1595_v60, %v1596_v2  ;;  %v1600_v10 = vsel %vm784_vm2, %v1578_v8, -inf }
 0x33f   : > { %v1584_v11 = vrot.slane %v1583_v5, 1  ;;  %v1589_v34 = vrot.slane %v1588_v7, 2  ;;  %v1601_v13 = vrot.slane %v1600_v10, 4 }
 0x340   : > { %v1598_v12 = vrot.slane %v1597_v6, 1 }
 0x341   : > { %v1585_v14 = vmax.f32 %v1583_v5, %v1584_v11  ;;  %v1590_v16 = vmax.f32 %v1588_v7, %v1589_v34  ;;  %v1602_v17 = vmax.f32 %v1600_v10, %v1601_v13  ;;  %v1966_v34 = vld [vmem:[%s3835_s9] sm:$0xff] }
 0x342   : > { %v1599_v15 = vmax.f32 %v1597_v6, %v1598_v12 }
 0x343   : > { %v1607_v18 = vsub.f32 %v1575_v53, %v1585_v14  ;;  %v1591_v20 = vrot.slane %v1590_v16, 1  ;;  %v1603_v21 = vrot.slane %v1602_v17, 2 }
 0x344   : > { %v1609_v19 = vsub.f32 %v1577_v51, %v1599_v15  ;;  %v1656_v15 = vld [vmem:[#allocation3 + $0x8] sm:$0xff] }
 0x345   : > { %v1611_v22 = vmul.f32 1.442695, %v1607_v18  ;;  %v1592_v24 = vmax.f32 %v1590_v16, %v1591_v20  ;;  %v1604_v42 = vmax.f32 %v1602_v17, %v1603_v21  ;;  %v1657_v16 = vld [vmem:[#allocation3 + $0x10] sm:$0xff] }
 0x346   : > { %v1615_v23 = vmul.f32 1.442695, %v1609_v19 }
 0x347   : > { %2782 = vpow2.f32 %v1611_v22  ;;  %v1608_v25 = vsub.f32 %v1576_v61, %v1592_v24  ;;  %v1605_v26 = vrot.slane %v1604_v42, 1 }
 0x348   : > { %2784 = vpow2.f32 %v1615_v23  ;;  %v1658_v23 = vld [vmem:[#allocation3 + $0x18] sm:$0xff] }
 0x349   : > { %v1613_v27 = vmul.f32 1.442695, %v1608_v25  ;;  %v1606_v28 = vmax.f32 %v1604_v42, %v1605_v26  ;;  %v1968_v26 = vld [vmem:[%s3835_s9 + $0x10] sm:$0xff] }
 0x34b   : > { %2786 = vpow2.f32 %v1613_v27  ;;  %v1610_v29 = vsub.f32 %v1578_v8, %v1606_v28  ;;  %v1969_v28 = vld [vmem:[%s3835_s9 + $0x18] sm:$0xff] }
 0x34d   : > { %v1617_v30 = vmul.f32 1.442695, %v1610_v29 }
 0x34f   : > { %2788 = vpow2.f32 %v1617_v30 }
 0x351   : > { %v2783_v31 = vpop.eup %2782 }
 0x352   : > { %v2785_v32 = vpop.eup %2784  ;;  %v1619_v33 = vsel %vm784_vm2, %v2783_v31, 0.0 }
 0x353   : > { %v1620_v35 = vrot.slane %v1619_v33, 4  ;;  %v1633_v36 = vsel %vm784_vm2, %v2785_v32, 0.0 }
 0x354   : > { %v1634_v37 = vrot.slane %v1633_v36, 4 }
 0x355   : > { %v2787_v39 = vpop.eup %2786  ;;  %v1621_v40 = vadd.f32 %v1620_v35, %v1619_v33 }
 0x356   : > { %v1635_v41 = vadd.f32 %v1634_v37, %v1633_v36  ;;  %v1626_v43 = vsel %vm784_vm2, %v2787_v39, 0.0 }
 0x357   : > { %v1622_v48 = vrot.slane %v1621_v40, 2  ;;  %v1627_v49 = vrot.slane %v1626_v43, 4 }
 0x358   : > { %v1636_v50 = vrot.slane %v1635_v41, 2 }
 0x359   : > { %v2789_v53 = vpop.eup %2788  ;;  %v1623_v51 = vadd.f32 %v1622_v48, %v1621_v40  ;;  %v1628_v52 = vadd.f32 %v1627_v49, %v1626_v43 }
 0x35a   : > { %v1637_v54 = vadd.f32 %v1636_v50, %v1635_v41  ;;  %v1640_v55 = vsel %vm784_vm2, %v2789_v53, 0.0 }
 0x35b   : > { %v1624_v56 = vrot.slane %v1623_v51, 1  ;;  %v1629_v57 = vrot.slane %v1628_v52, 2  ;;  %v1641_v58 = vrot.slane %v1640_v55, 4 }
 0x35c   : > { %v1638_v59 = vrot.slane %v1637_v54, 1 }
 0x35d   : > { %v1625_v38 = vadd.f32 %v1624_v56, %v1623_v51  ;;  %v1630_v60 = vadd.f32 %v1629_v57, %v1628_v52  ;;  %v1642_v61 = vadd.f32 %v1641_v58, %v1640_v55 }
 0x35e   : > { %v1639_v62 = vadd.f32 %v1638_v59, %v1637_v54 }
 0x35f   : > { %2790 = vrcp.f32 %v1625_v38  ;;  %v1631_v63 = vrot.slane %v1630_v60, 1  ;;  %v1643_v0 = vrot.slane %v1642_v61, 2 }
 0x360   : > { %2792 = vrcp.f32 %v1639_v62 }
 0x361   : > { %v1632_v2 = vadd.f32 %v1631_v63, %v1630_v60  ;;  %v1644_v3 = vadd.f32 %v1643_v0, %v1642_v61 }
 0x363   : > { %2794 = vrcp.f32 %v1632_v2  ;;  %v1645_v4 = vrot.slane %v1644_v3, 1 }
 0x365   : > { %v1646_v5 = vadd.f32 %v1645_v4, %v1644_v3 }
 0x367   : > { %2796 = vrcp.f32 %v1646_v5 }
 0x369   : > { %v2791_v6 = vpop.eup %2790 }
 0x36a   : > { %v1651_v7 = vmul.f32 %v2791_v6, %v2783_v31  ;;  %v2793_v8 = vpop.eup %2792 }
 0x36b   : > { %v1653_v11 = vmul.f32 %v2793_v8, %v2785_v32 }
 0x36c   : > { %2604 = vmatmul.mubr.msk.f32.vlgmr.msra.gmra.mrb[6].mxu0 %vm784_vm2, %v1651_v7 }
 0x36d   : > { %v2795_v9 = vpop.eup %2794  ;;  %2612 = vmatpush3.msra.mxu0 %v1254_v46  ;;  %2613 = vmatprep.mubr.msk.f32.mxu0 %vm3106_vm0, %v3107_v1 }
 0x36e   : > { %v1652_v10 = vmul.f32 %v2795_v9, %v2787_v39  ;;  %2621 = vmatprep.subr.mxu0 %v3107_v1 }
 0x370   : > { %2609 = vmatmul.mubr.msk.f32.vlgmr.msra.gmra.mrb[8].mxu1 %vm784_vm2, %v1652_v10  ;;  %2614 = vmatmul.mubr.msk.f32.vlgmr.msra.gmra.mrb[8].mxu0 %vm784_vm2, %v1653_v11 }
 0x371   : > { %v2797_v12 = vpop.eup %2796  ;;  %2617 = vmatpush3.msra.mxu1 %v1255_v47  ;;  %2618 = vmatprep.mubr.msk.f32.mxu1 %vm3106_vm0, %v3107_v1 }
 0x372   : > { %v1654_v46 = vmul.f32 %v2797_v12, %v2789_v53  ;;  %2623 = vmatprep.mubr.msk.f32.mxu0 %vm3106_vm0, %v3107_v1  ;;  %2626 = vmatprep.subr.mxu1 %v3107_v1  ;;  %v2504_v53 = vld [vmem:[%s3838_s11] ss:$0 sm:$0xff] }
 0x373   : > { %2622 = vmatpush3.msra.mxu0 %v1966_v34 }
 0x374   : > { %2619 = vmatmul.mubr.msk.f32.vlgmr.msra.gmra.mrb[10].mxu1 %vm784_vm2, %v1654_v46  ;;  %2631 = vmatprep.subr.mxu0 %v3107_v1 }
 0x375   : > { %2628 = vmatprep.mubr.msk.f32.mxu1 %vm3106_vm0, %v3107_v1  ;;  %2627 = vmatpush3.msra.mxu1 %v1967_v44 }
 0x376   : > { %2636 = vmatprep.subr.mxu1 %v3107_v1 }
 0x43f   : > { %v1728_v47 = vpop.f32.mrb[6].mxu0 }
 0x440   : > { %v1951_v13 = vadd.f32 %v1728_v47, %v1655_v45  ;;  %v2605_v14 = vpop.f32.mrb[7].mxu0 }
 0x442   : > { %1955 = vst.msk [vmem:[#allocation3] sm:$0xff] %vm784_vm2, %v1951_v13 }
 0x443   : > { %v1801_v17 = vpop.f32.mrb[8].mxu1  ;;  %v1874_v18 = vpop.f32.mrb[8].mxu0 }
 0x444   : > { %v1952_v19 = vadd.f32 %v1801_v17, %v1656_v15  ;;  %v1953_v20 = vadd.f32 %v1874_v18, %v1657_v16  ;;  %v2610_v21 = vpop.f32.mrb[9].mxu1  ;;  %v2615_v22 = vpop.f32.mrb[9].mxu0 }
 0x446   : > { %1956 = vst.msk [vmem:[#allocation3 + $0x8] sm:$0xff] %vm784_vm2, %v1952_v19  ;;  %1957 = vst.msk [vmem:[#allocation3 + $0x10] sm:$0xff] %vm784_vm2, %v1953_v20 }
 0x447   : > { %v1947_v24 = vpop.f32.mrb[10].mxu1 }
 0x448   : > { %v1954_v42 = vadd.f32 %v1947_v24, %v1658_v23  ;;  %v2620_v25 = vpop.f32.mrb[11].mxu1 }
 0x449   : > { %v1962_v27 = vld [vmem:[#allocation3] sm:$0xff] }
 0x44a   : > { %1958 = vst.msk [vmem:[#allocation3 + $0x18] sm:$0xff] %vm784_vm2, %v1954_v42  ;;  %2624 = vmatmul.mubr.msk.f32.vlgmr.msra.gmra.mrb[10].mxu0 %vm784_vm2, %v1962_v27 }
 0x44b   : > { %2632 = vmatpush3.msra.mxu0 %v1968_v26  ;;  %2633 = vmatprep.mubr.msk.f32.mxu0 %vm3106_vm0, %v3107_v1 }
 0x44d   : > { %v1963_v29 = vld [vmem:[#allocation3 + $0x8] sm:$0xff]  ;;  %v1964_v30 = vld [vmem:[#allocation3 + $0x10] sm:$0xff] }
 0x44e   : > { %2629 = vmatmul.mubr.msk.f32.vlgmr.msra.gmra.mrb[12].mxu1 %vm784_vm2, %v1963_v29  ;;  %2634 = vmatmul.mubr.msk.f32.vlgmr.msra.gmra.mrb[12].mxu0 %vm784_vm2, %v1964_v30 }
 0x44f   : > { %2637 = vmatpush3.msra.mxu1 %v1969_v28  ;;  %2638 = vmatprep.mubr.msk.f32.mxu1 %vm3106_vm0, %v3107_v1 }
 0x451   : > { %v1965_v31 = vld [vmem:[#allocation3 + $0x18] sm:$0xff] }
 0x452   : > { %2639 = vmatmul.mubr.msk.f32.vlgmr.msra.gmra.mrb[14].mxu1 %vm784_vm2, %v1965_v31 }
 0x51d   : > { %v2039_v32 = vpop.f32.mrb[10].mxu0 }
 0x51e   : > { %v2625_v33 = vpop.f32.mrb[11].mxu0  ;;  %v2262_v37 = vsel %vm563_vm1, %v2039_v32, 0.0 }
 0x521   : > { %v2112_v35 = vpop.f32.mrb[12].mxu1  ;;  %v2185_v36 = vpop.f32.mrb[12].mxu0 }
 0x522   : > { %v2263_v39 = vsel %vm563_vm1, %v2112_v35, 0.0  ;;  %v2630_v40 = vpop.f32.mrb[13].mxu1  ;;  %v2635_v41 = vpop.f32.mrb[13].mxu0  ;;  %v2265_v48 = vsel %vm563_vm1, %v2185_v36, 0.0 }
 0x523   : > { %v2264_v43 = vadd.f32 %v2263_v39, %v2262_v37 }
 0x525   : > { %v2266_v1 = vadd.f32 %v2265_v48, %v2264_v43  ;;  %v2258_v49 = vpop.f32.mrb[14].mxu1 }
 0x526   : > { %v2267_v50 = vsel %vm563_vm1, %v2258_v49, 0.0  ;;  %v2640_v51 = vpop.f32.mrb[15].mxu1 }
 0x527   : > { %v2268_v52 = vadd.f32 %v2267_v50, %v2266_v1 }
 0x529   : > { %v2276_v54 = vadd.f32 %v2504_v53, %v2268_v52 }
 0x52b   : > { %2277 = vst.msk [vmem:[%s546_s25] sm:$0xff] %vm563_vm1, %v2276_v54 }
 0x52c   : > { %3013 = shalt.err (!%p3010_p11)
}
 0x52d   : > { %s3014_s21 = scalar_lea.hbm %s3708_s17, 128  ;;  %s3018_s1 = scalar_lea.hbm %s3839_s3, 256 }
 0x52e   : > { %p3015_p5 = scmp.ne.s32.totalorder %s3708_s17, %s3014_s21  ;;  %p3019_p0 = scmp.lt.u32.totalorder %s3708_s17, %s3839_s3 }
 0x52f   : > { %p3020_p4 = scmp.lt.u32.totalorder %s3018_s1, %s3014_s21  ;;  %p3022_p13 = scmp.lt.u32.totalorder %s3014_s21, %s3708_s17 }
 0x530   : > { %p3016_p3 = pnand %p3015_p5, %p3840_p2 }
 0x531   : > { %p3021_p10 = por %p3020_p4, %p3019_p0 }
 0x532   : > { %p3017_p6 = pneg %p3016_p3 }
 0x533   : > { %p3023_p1 = por %p3022_p13, %p3021_p10 }
 0x535   : > { %p3024_p12 = pnand %p3023_p1, %p3017_p6 }
 0x537   : > { %3027 = shalt.err (!%p3024_p12)
}
 0x538   : > { %2681 = dma.vmem_to_hbm [thread:$0]  (%p3840_p2), %s3710_s13, 128, %s3708_s17, %s2279_s30  }
 0x539 PF: > { %s3841_s12 = sld [smem:[#allocation22_spill]]  ;;  %s3842_s15 = sld [smem:[#allocation29_spill]] }
 0x53a   : > { %s3843_s11 = sld [smem:[#allocation25_spill]] }
 0x53f   : > { %s2304_s23 = sand.u32 1, %s3841_s12   ;;  %p3844_p8 = scmp.ne.s32.totalorder %s3842_s15, 0 }
 0x540   : > { %p3845_p9 = scmp.ge.s32.totalorder %s3843_s11, 2  ;;  %s2305_s25 = scalar_lea.sflag [#allocation6], %s2304_s23 }
 0x542   : > { %p2707_p7 = pnand %p3845_p9, %p3844_p8 }
 0x544   : > { %3069 = dma.done.wait (!%p2707_p7), %s2305_s25, 128  }
 0x545   : > { %3071 = vsyncadd (!%p2707_p7), %s2305_s25, 4294967168  ;;  %s32_s22 = sadd.s32 1, %s3843_s11   ;;  %s3846_s24 = sld [smem:[#allocation28_spill]] }
 0x546   : > { %p29_p11 = scmp.ge.s32.totalorder %s32_s22, 4   ;;  %s3847_s20 = sld [smem:[#allocation24_spill]] }
 0x547   : > { %s3848_s21 = sld [smem:[#allocation26_spill]]  ;;  %s3849_s17 = smov %s3078_s18 }
 0x548   : > { %s3850_s18 = smov %s3082_s19  ;;  %31 = sbr.rel (!%p29_p11) target bundleno = 17 (0x11), region = 157 }
 0x54b   : > { %s3851_s19 = smov %s3846_s24 }
 0x54f   :  { %2310 = vsyncpa [#allocation5], 1 }
 0x550   :  { %2312 = vsyncpa [#allocation5 + $0x1], 1 }
 0x551   :  { %2313 = vsyncpa [#allocation8], 1 }
 0x552   :  { %2315 = vsyncpa [#allocation8 + $0x1], 1 }
 0x553   :  { %2316 = vsyncpa [#allocation11], 1 }
 0x554   :  { %2317 = vsyncpa [#allocation14], 1 }
 0x555   :  { %2318 = vsyncpa [#allocation6], 1 }
 0x556   :  { %2320 = vsyncpa [#allocation6 + $0x1], 1 }

</bundles_post_ra>
